<compile_context>
chip_gen: v7x
topology: tpu7x:2x2x1
jax: 0.10.0
libtpu: 0.0.40
codegen_flags: <defaults>
</compile_context>

<pallas_src>
import math

import jax
import jax.numpy as jnp
from jax.experimental import pallas as pl
from jax.experimental.pallas import tpu as pltpu

# ----------------------------- small config ---------------------------------
VOCAB = 100     # vocab size
H = 32          # hidden size
NH = 2          # attention heads
DH = H // NH    # head dim
I = 64          # intermediate (FFN) size
L = 2           # number of encoder layers
S = 8           # sequence length
B = 2           # batch
MAXPOS = 16     # max position embeddings
LN_EPS = 1e-12  # BERT layernorm eps


# ------------------------------ helpers (in-kernel) --------------------------
def _layernorm(x, gamma, beta):
    mu = jnp.mean(x, axis=-1, keepdims=True)
    var = jnp.mean((x - mu) ** 2, axis=-1, keepdims=True)
    return (x - mu) * jax.lax.rsqrt(var + LN_EPS) * gamma + beta


def _gelu(x):
    # tanh-approximate GELU (EUP-friendly).
    # TODO(synk): HF BertIntermediate uses exact erf GELU; deviation ~1e-3.
    c = 0.7978845608028654  # sqrt(2/pi)
    return 0.5 * x * (1.0 + jnp.tanh(c * (x + 0.044715 * x * x * x)))


# ------------------------------ Pallas kernel --------------------------------
def bert_kernel(x_ref, mask_ref, embg_ref, embb_ref,
                wqkv_ref, bqkv_ref, wo_ref, bo_ref, ln1g_ref, ln1b_ref,
                w1_ref, b1_ref, w2_ref, b2_ref, ln2g_ref, ln2b_ref,
                cls_ref):
    """Embedding LN + L encoder layers + CLS emit, single invocation."""
    # Flat (B*S, H) activations: every projection is a single 2-D MXU dot.
    h = x_ref[...].astype(jnp.float32).reshape(B * S, H)
    h = _layernorm(h, embg_ref[...], embb_ref[...])          # fused embedding LN

    mask = mask_ref[...]        # (NH*B, 1, S), already head-replicated in wrapper
    scale = 1.0 / math.sqrt(DH)

    def split_heads(flat, which):
        # flat: (B*S, 3H) fused QKV activations; which: 0=q, 1=k, 2=v.
        # Fold heads into the leading batch dim -> (NH*B, S, DH), head-major.
        cols = [flat[:, which * H + hd * DH: which * H + (hd + 1) * DH]
                for hd in range(NH)]
        return jnp.concatenate(cols, axis=0).reshape(NH * B, S, DH)

    for l in range(L):          # static unrolled layer loop; weights VMEM-resident
        # --- self attention: fused QKV projection (one bf16 MXU dot) ---
        qkv = (jnp.dot(h.astype(jnp.bfloat16), wqkv_ref[l],
                       preferred_element_type=jnp.float32) + bqkv_ref[l])
        q = split_heads(qkv, 0).astype(jnp.bfloat16)
        k = split_heads(qkv, 1).astype(jnp.bfloat16)
        v = split_heads(qkv, 2).astype(jnp.bfloat16)

        # Head-batched attention: one score einsum, one softmax, one ctx einsum.
        s = (jnp.einsum('bqd,bkd->bqk', q, k,
                        preferred_element_type=jnp.float32) * scale + mask)
        m = jnp.max(s, axis=-1, keepdims=True)
        p = jnp.exp(s - m)
        p = p * pl.reciprocal(jnp.sum(p, axis=-1, keepdims=True), approx=True)
        ctx = jnp.einsum('bqk,bkd->bqd', p.astype(jnp.bfloat16), v,
                         preferred_element_type=jnp.float32)

        # Fold heads back into lanes: (NH*B, S, DH) -> (B*S, H).
        ctx2 = ctx.reshape(NH * B * S, DH)
        ctx = jnp.concatenate(
            [ctx2[hd * B * S:(hd + 1) * B * S, :] for hd in range(NH)], axis=-1)

        attn = (jnp.dot(ctx.astype(jnp.bfloat16), wo_ref[l],
                        preferred_element_type=jnp.float32) + bo_ref[l])
        h1 = _layernorm(h + attn, ln1g_ref[l], ln1b_ref[l])

        # --- feed forward ---
        ffn = _gelu(jnp.dot(h1.astype(jnp.bfloat16), w1_ref[l],
                            preferred_element_type=jnp.float32) + b1_ref[l])
        ffn = (jnp.dot(ffn.astype(jnp.bfloat16), w2_ref[l],
                       preferred_element_type=jnp.float32) + b2_ref[l])
        h = _layernorm(h1 + ffn, ln2g_ref[l], ln2b_ref[l])

    # Emit only the CLS rows: a single strided slice (one relayout, one store).
    cls_ref[...] = h.reshape(B, S, H)[:, 0, :].astype(cls_ref.dtype)


# ------------------------------ wrapper --------------------------------------
def bert_encoder_cls(emb, add_mask_h, p):
    vmem = pl.BlockSpec(memory_space=pltpu.MemorySpace.VMEM)   # whole array, VMEM
    return pl.pallas_call(
        bert_kernel,
        out_shape=jax.ShapeDtypeStruct((B, H), jnp.float32),
        in_specs=[vmem] * 16,
        out_specs=vmem,
    )(emb, add_mask_h, p['emb_ln_g'], p['emb_ln_b'],
      p['wqkv'], p['bqkv'], p['wo'], p['bo'], p['ln1_g'], p['ln1_b'],
      p['w1'], p['b1'], p['w2'], p['b2'], p['ln2_g'], p['ln2_b'])


def init_params(key):
    ks = jax.random.split(key, 10)

    def nrm(k, shape):
        return jax.random.normal(k, shape, jnp.float32) * 0.02

    z = lambda shape: jnp.zeros(shape, jnp.float32)
    o = lambda shape: jnp.ones(shape, jnp.float32)
    bf = jnp.bfloat16

    wq = nrm(ks[3], (L, H, H))
    wk = nrm(ks[4], (L, H, H))
    wv = nrm(ks[5], (L, H, H))

    return dict(
        word_emb=nrm(ks[0], (VOCAB, H)),
        pos_emb=nrm(ks[1], (MAXPOS, H)),
        type_emb=nrm(ks[2], (2, H)),
        emb_ln_g=o((1, H)), emb_ln_b=z((1, H)),
        # Q/K/V fused into one (H, 3H) projection; weights stored bf16
        # (MXU-native), biases / LN params kept f32.
        wqkv=jnp.concatenate([wq, wk, wv], axis=-1).astype(bf),   # (L, H, 3H)
        bqkv=z((L, 1, 3 * H)),
        wo=nrm(ks[6], (L, H, H)).astype(bf), bo=z((L, 1, H)),
        ln1_g=o((L, 1, H)), ln1_b=z((L, 1, H)),
        w1=nrm(ks[7], (L, H, I)).astype(bf), b1=z((L, 1, I)),
        w2=nrm(ks[8], (L, I, H)).astype(bf), b2=z((L, 1, H)),
        ln2_g=o((L, 1, H)), ln2_b=z((L, 1, H)),
    )


def bioclinicalbert_ft_forward(params, input_ids, attention_mask):
    """Equivalent of BioClinicalBERT_FT.forward -> CLS embedding (B, H)."""
    Bp, Sp = input_ids.shape
    # Embedding lookup (glue: gathers stay in plain JAX; LN is fused in-kernel).
    # TODO(synk): token_type_ids implicitly all zero (single-segment input).
    emb = (jnp.take(params['word_emb'], input_ids, axis=0)
           + params['pos_emb'][None, :Sp, :]
           + params['type_emb'][0][None, None, :])

    # Additive attention mask, head-replicated here so the kernel never
    # materializes a broadcast: (NH*B, 1, S), head-major ordering to match
    # the kernel's head-batched layout.
    add_mask = (1.0 - attention_mask.astype(jnp.float32)) * -1e9     # (B, S)
    add_mask_h = jnp.tile(add_mask[:, None, :], (NH, 1, 1))          # (NH*B,1,S)

    return bert_encoder_cls(emb, add_mask_h, params)


if __name__ == "__main__":
    key = jax.random.PRNGKey(0)
    params = init_params(key)

    kid, kmask = jax.random.split(jax.random.fold_in(key, 123))
    input_ids = jax.random.randint(kid, (B, S), 0, VOCAB, dtype=jnp.int32)
    attention_mask = jnp.ones((B, S), jnp.int32)
    attention_mask = attention_mask.at[1, S - 2:].set(0)  # some padding

    cls = bioclinicalbert_ft_forward(params, input_ids, attention_mask)
    cls = jax.block_until_ready(cls)
    assert cls.shape == (B, H) and cls.dtype == jnp.float32
    assert bool(jnp.all(jnp.isfinite(cls)))
    print("KERNEL_OK")
</pallas_src>

<mosaic_0001>
module attributes {stable_mosaic.version = 11 : i64} {
  func.func @bert_kernel(%arg0: memref<2x8x32xf32, #tpu.memory_space<vmem>>, %arg1: memref<4x1x8xf32, #tpu.memory_space<vmem>>, %arg2: memref<1x32xf32, #tpu.memory_space<vmem>>, %arg3: memref<1x32xf32, #tpu.memory_space<vmem>>, %arg4: memref<2x32x96xbf16, #tpu.memory_space<vmem>>, %arg5: memref<2x1x96xf32, #tpu.memory_space<vmem>>, %arg6: memref<2x32x32xbf16, #tpu.memory_space<vmem>>, %arg7: memref<2x1x32xf32, #tpu.memory_space<vmem>>, %arg8: memref<2x1x32xf32, #tpu.memory_space<vmem>>, %arg9: memref<2x1x32xf32, #tpu.memory_space<vmem>>, %arg10: memref<2x32x64xbf16, #tpu.memory_space<vmem>>, %arg11: memref<2x1x64xf32, #tpu.memory_space<vmem>>, %arg12: memref<2x64x32xbf16, #tpu.memory_space<vmem>>, %arg13: memref<2x1x32xf32, #tpu.memory_space<vmem>>, %arg14: memref<2x1x32xf32, #tpu.memory_space<vmem>>, %arg15: memref<2x1x32xf32, #tpu.memory_space<vmem>>, %arg16: memref<2x32xf32, #tpu.memory_space<vmem>>) attributes {dimension_semantics = [], scalar_prefetch = 0 : i64, scratch_operands = 0 : i64, tpu.core_type = #tpu.core_type<tc>} {
    %c0 = arith.constant 0 : index
    %c0_0 = arith.constant 0 : index
    %c0_1 = arith.constant 0 : index
    %0 = vector.load %arg0[%c0, %c0_0, %c0_1] : memref<2x8x32xf32, #tpu.memory_space<vmem>>, vector<2x8x32xf32>
    %1 = vector.shape_cast %0 : vector<2x8x32xf32> to vector<16x32xf32>
    %c0_2 = arith.constant 0 : index
    %c0_3 = arith.constant 0 : index
    %2 = vector.load %arg2[%c0_2, %c0_3] : memref<1x32xf32, #tpu.memory_space<vmem>>, vector<1x32xf32>
    %c0_4 = arith.constant 0 : index
    %c0_5 = arith.constant 0 : index
    %3 = vector.load %arg3[%c0_4, %c0_5] : memref<1x32xf32, #tpu.memory_space<vmem>>, vector<1x32xf32>
    %cst = arith.constant dense<0.000000e+00> : vector<16xf32>
    %4 = vector.multi_reduction <add>, %1, %cst [1] : vector<16x32xf32> to vector<16xf32>
    %5 = vector.shape_cast %4 : vector<16xf32> to vector<16x1xf32>
    %cst_6 = arith.constant 3.200000e+01 : f32
    %6 = vector.broadcast %cst_6 : f32 to vector<16x1xf32>
    %7 = arith.divf %5, %6 : vector<16x1xf32>
    %8 = vector.broadcast %7 : vector<16x1xf32> to vector<16x32xf32>
    %9 = arith.subf %1, %8 : vector<16x32xf32>
    %10 = arith.mulf %9, %9 : vector<16x32xf32>
    %cst_7 = arith.constant dense<0.000000e+00> : vector<16xf32>
    %11 = vector.multi_reduction <add>, %10, %cst_7 [1] : vector<16x32xf32> to vector<16xf32>
    %12 = vector.shape_cast %11 : vector<16xf32> to vector<16x1xf32>
    %cst_8 = arith.constant 3.200000e+01 : f32
    %13 = vector.broadcast %cst_8 : f32 to vector<16x1xf32>
    %14 = arith.divf %12, %13 : vector<16x1xf32>
    %15 = vector.broadcast %7 : vector<16x1xf32> to vector<16x32xf32>
    %16 = arith.subf %1, %15 : vector<16x32xf32>
    %cst_9 = arith.constant 9.99999996E-13 : f32
    %17 = vector.broadcast %cst_9 : f32 to vector<16x1xf32>
    %18 = arith.addf %14, %17 : vector<16x1xf32>
    %19 = math.rsqrt %18 : vector<16x1xf32>
    %20 = vector.broadcast %19 : vector<16x1xf32> to vector<16x32xf32>
    %21 = arith.mulf %16, %20 : vector<16x32xf32>
    %22 = vector.broadcast %2 : vector<1x32xf32> to vector<16x32xf32>
    %23 = arith.mulf %21, %22 : vector<16x32xf32>
    %24 = vector.broadcast %3 : vector<1x32xf32> to vector<16x32xf32>
    %25 = arith.addf %23, %24 : vector<16x32xf32>
    %c0_10 = arith.constant 0 : index
    %c0_11 = arith.constant 0 : index
    %c0_12 = arith.constant 0 : index
    %26 = vector.load %arg1[%c0_10, %c0_11, %c0_12] : memref<4x1x8xf32, #tpu.memory_space<vmem>>, vector<4x1x8xf32>
    %27 = arith.truncf %25 : vector<16x32xf32> to vector<16x32xbf16>
    %c0_13 = arith.constant 0 : index
    %c0_14 = arith.constant 0 : index
    %c0_15 = arith.constant 0 : index
    %28 = vector.load %arg4[%c0_13, %c0_14, %c0_15] : memref<2x32x96xbf16, #tpu.memory_space<vmem>>, vector<1x32x96xbf16>
    %29 = vector.shape_cast %28 : vector<1x32x96xbf16> to vector<32x96xbf16>
    %cst_16 = arith.constant dense<0.000000e+00> : vector<16x96xf32>
    %30 = tpu.matmul %27, %29, %cst_16 {dimension_numbers = #tpu.dot_dimension_numbers<[1], [0], [0], [1], [0, 0, 1, 1], [], []>} : vector<16x32xbf16>, vector<32x96xbf16>, vector<16x96xf32> -> vector<16x96xf32>
    %c0_17 = arith.constant 0 : index
    %c0_18 = arith.constant 0 : index
    %c0_19 = arith.constant 0 : index
    %31 = vector.load %arg5[%c0_17, %c0_18, %c0_19] : memref<2x1x96xf32, #tpu.memory_space<vmem>>, vector<1x1x96xf32>
    %32 = vector.shape_cast %31 : vector<1x1x96xf32> to vector<1x96xf32>
    %33 = vector.broadcast %32 : vector<1x96xf32> to vector<16x96xf32>
    %34 = arith.addf %30, %33 : vector<16x96xf32>
    %35 = vector.extract_strided_slice %34 {offsets = [0, 0], sizes = [16, 16], strides = [1, 1]} : vector<16x96xf32> to vector<16x16xf32>
    %36 = vector.extract_strided_slice %34 {offsets = [0, 16], sizes = [16, 16], strides = [1, 1]} : vector<16x96xf32> to vector<16x16xf32>
    %37 = tpu.concatenate %35, %36 in 0 : vector<16x16xf32>, vector<16x16xf32> -> vector<32x16xf32>
    %38 = vector.shape_cast %37 : vector<32x16xf32> to vector<4x8x16xf32>
    %39 = arith.truncf %38 : vector<4x8x16xf32> to vector<4x8x16xbf16>
    %40 = vector.extract_strided_slice %34 {offsets = [0, 32], sizes = [16, 16], strides = [1, 1]} : vector<16x96xf32> to vector<16x16xf32>
    %41 = vector.extract_strided_slice %34 {offsets = [0, 48], sizes = [16, 16], strides = [1, 1]} : vector<16x96xf32> to vector<16x16xf32>
    %42 = tpu.concatenate %40, %41 in 0 : vector<16x16xf32>, vector<16x16xf32> -> vector<32x16xf32>
    %43 = vector.shape_cast %42 : vector<32x16xf32> to vector<4x8x16xf32>
    %44 = arith.truncf %43 : vector<4x8x16xf32> to vector<4x8x16xbf16>
    %45 = vector.extract_strided_slice %34 {offsets = [0, 64], sizes = [16, 16], strides = [1, 1]} : vector<16x96xf32> to vector<16x16xf32>
    %46 = vector.extract_strided_slice %34 {offsets = [0, 80], sizes = [16, 16], strides = [1, 1]} : vector<16x96xf32> to vector<16x16xf32>
    %47 = tpu.concatenate %45, %46 in 0 : vector<16x16xf32>, vector<16x16xf32> -> vector<32x16xf32>
    %48 = vector.shape_cast %47 : vector<32x16xf32> to vector<4x8x16xf32>
    %49 = arith.truncf %48 : vector<4x8x16xf32> to vector<4x8x16xbf16>
    "tpu.trace_start"() <{level = 10 : i32, message = "bqd,bkd->bqk"}> : () -> ()
    %cst_20 = arith.constant dense<0.000000e+00> : vector<4x8x8xf32>
    %50 = tpu.matmul %39, %44, %cst_20 {dimension_numbers = #tpu.dot_dimension_numbers<[2], [2], [1], [1], [0, 0, 0, 1, 1, 1], [0], [0]>} : vector<4x8x16xbf16>, vector<4x8x16xbf16>, vector<4x8x8xf32> -> vector<4x8x8xf32>
    "tpu.trace_stop"() : () -> ()
    %cst_21 = arith.constant 2.500000e-01 : f32
    %51 = vector.broadcast %cst_21 : f32 to vector<4x8x8xf32>
    %52 = arith.mulf %50, %51 : vector<4x8x8xf32>
    %53 = vector.broadcast %26 : vector<4x1x8xf32> to vector<4x8x8xf32>
    %54 = arith.addf %52, %53 : vector<4x8x8xf32>
    %cst_22 = arith.constant dense<0xFF800000> : vector<4x8xf32>
    %55 = vector.multi_reduction <maximumf>, %54, %cst_22 [2] : vector<4x8x8xf32> to vector<4x8xf32>
    %56 = vector.shape_cast %55 : vector<4x8xf32> to vector<4x8x1xf32>
    %57 = vector.broadcast %56 : vector<4x8x1xf32> to vector<4x8x8xf32>
    %58 = arith.subf %54, %57 : vector<4x8x8xf32>
    %59 = math.exp %58 : vector<4x8x8xf32>
    %cst_23 = arith.constant dense<0.000000e+00> : vector<4x8xf32>
    %60 = vector.multi_reduction <add>, %59, %cst_23 [2] : vector<4x8x8xf32> to vector<4x8xf32>
    %61 = vector.shape_cast %60 : vector<4x8xf32> to vector<4x8x1xf32>
    %62 = tpu.reciprocal %61 {approx = true} : vector<4x8x1xf32> -> vector<4x8x1xf32>
    %63 = vector.broadcast %62 : vector<4x8x1xf32> to vector<4x8x8xf32>
    %64 = arith.mulf %59, %63 : vector<4x8x8xf32>
    %65 = arith.truncf %64 : vector<4x8x8xf32> to vector<4x8x8xbf16>
    "tpu.trace_start"() <{level = 10 : i32, message = "bqk,bkd->bqd"}> : () -> ()
    %cst_24 = arith.constant dense<0.000000e+00> : vector<4x8x16xf32>
    %66 = tpu.matmul %65, %49, %cst_24 {dimension_numbers = #tpu.dot_dimension_numbers<[2], [1], [1], [2], [0, 0, 0, 1, 1, 2], [0], [0]>} : vector<4x8x8xbf16>, vector<4x8x16xbf16>, vector<4x8x16xf32> -> vector<4x8x16xf32>
    "tpu.trace_stop"() : () -> ()
    %67 = vector.shape_cast %66 : vector<4x8x16xf32> to vector<32x16xf32>
    %68 = vector.extract_strided_slice %67 {offsets = [0, 0], sizes = [16, 16], strides = [1, 1]} : vector<32x16xf32> to vector<16x16xf32>
    %69 = vector.extract_strided_slice %67 {offsets = [16, 0], sizes = [16, 16], strides = [1, 1]} : vector<32x16xf32> to vector<16x16xf32>
    %70 = tpu.concatenate %68, %69 in 1 : vector<16x16xf32>, vector<16x16xf32> -> vector<16x32xf32>
    %71 = arith.truncf %70 : vector<16x32xf32> to vector<16x32xbf16>
    %c0_25 = arith.constant 0 : index
    %c0_26 = arith.constant 0 : index
    %c0_27 = arith.constant 0 : index
    %72 = vector.load %arg6[%c0_25, %c0_26, %c0_27] : memref<2x32x32xbf16, #tpu.memory_space<vmem>>, vector<1x32x32xbf16>
    %73 = vector.shape_cast %72 : vector<1x32x32xbf16> to vector<32x32xbf16>
    %cst_28 = arith.constant dense<0.000000e+00> : vector<16x32xf32>
    %74 = tpu.matmul %71, %73, %cst_28 {dimension_numbers = #tpu.dot_dimension_numbers<[1], [0], [0], [1], [0, 0, 1, 1], [], []>} : vector<16x32xbf16>, vector<32x32xbf16>, vector<16x32xf32> -> vector<16x32xf32>
    %c0_29 = arith.constant 0 : index
    %c0_30 = arith.constant 0 : index
    %c0_31 = arith.constant 0 : index
    %75 = vector.load %arg7[%c0_29, %c0_30, %c0_31] : memref<2x1x32xf32, #tpu.memory_space<vmem>>, vector<1x1x32xf32>
    %76 = vector.shape_cast %75 : vector<1x1x32xf32> to vector<1x32xf32>
    %77 = vector.broadcast %76 : vector<1x32xf32> to vector<16x32xf32>
    %78 = arith.addf %74, %77 : vector<16x32xf32>
    %79 = arith.addf %25, %78 : vector<16x32xf32>
    %c0_32 = arith.constant 0 : index
    %c0_33 = arith.constant 0 : index
    %c0_34 = arith.constant 0 : index
    %80 = vector.load %arg8[%c0_32, %c0_33, %c0_34] : memref<2x1x32xf32, #tpu.memory_space<vmem>>, vector<1x1x32xf32>
    %81 = vector.shape_cast %80 : vector<1x1x32xf32> to vector<1x32xf32>
    %c0_35 = arith.constant 0 : index
    %c0_36 = arith.constant 0 : index
    %c0_37 = arith.constant 0 : index
    %82 = vector.load %arg9[%c0_35, %c0_36, %c0_37] : memref<2x1x32xf32, #tpu.memory_space<vmem>>, vector<1x1x32xf32>
    %83 = vector.shape_cast %82 : vector<1x1x32xf32> to vector<1x32xf32>
    %cst_38 = arith.constant dense<0.000000e+00> : vector<16xf32>
    %84 = vector.multi_reduction <add>, %79, %cst_38 [1] : vector<16x32xf32> to vector<16xf32>
    %85 = vector.shape_cast %84 : vector<16xf32> to vector<16x1xf32>
    %cst_39 = arith.constant 3.200000e+01 : f32
    %86 = vector.broadcast %cst_39 : f32 to vector<16x1xf32>
    %87 = arith.divf %85, %86 : vector<16x1xf32>
    %88 = vector.broadcast %87 : vector<16x1xf32> to vector<16x32xf32>
    %89 = arith.subf %79, %88 : vector<16x32xf32>
    %90 = arith.mulf %89, %89 : vector<16x32xf32>
    %cst_40 = arith.constant dense<0.000000e+00> : vector<16xf32>
    %91 = vector.multi_reduction <add>, %90, %cst_40 [1] : vector<16x32xf32> to vector<16xf32>
    %92 = vector.shape_cast %91 : vector<16xf32> to vector<16x1xf32>
    %cst_41 = arith.constant 3.200000e+01 : f32
    %93 = vector.broadcast %cst_41 : f32 to vector<16x1xf32>
    %94 = arith.divf %92, %93 : vector<16x1xf32>
    %95 = vector.broadcast %87 : vector<16x1xf32> to vector<16x32xf32>
    %96 = arith.subf %79, %95 : vector<16x32xf32>
    %cst_42 = arith.constant 9.99999996E-13 : f32
    %97 = vector.broadcast %cst_42 : f32 to vector<16x1xf32>
    %98 = arith.addf %94, %97 : vector<16x1xf32>
    %99 = math.rsqrt %98 : vector<16x1xf32>
    %100 = vector.broadcast %99 : vector<16x1xf32> to vector<16x32xf32>
    %101 = arith.mulf %96, %100 : vector<16x32xf32>
    %102 = vector.broadcast %81 : vector<1x32xf32> to vector<16x32xf32>
    %103 = arith.mulf %101, %102 : vector<16x32xf32>
    %104 = vector.broadcast %83 : vector<1x32xf32> to vector<16x32xf32>
    %105 = arith.addf %103, %104 : vector<16x32xf32>
    %106 = arith.truncf %105 : vector<16x32xf32> to vector<16x32xbf16>
    %c0_43 = arith.constant 0 : index
    %c0_44 = arith.constant 0 : index
    %c0_45 = arith.constant 0 : index
    %107 = vector.load %arg10[%c0_43, %c0_44, %c0_45] : memref<2x32x64xbf16, #tpu.memory_space<vmem>>, vector<1x32x64xbf16>
    %108 = vector.shape_cast %107 : vector<1x32x64xbf16> to vector<32x64xbf16>
    %cst_46 = arith.constant dense<0.000000e+00> : vector<16x64xf32>
    %109 = tpu.matmul %106, %108, %cst_46 {dimension_numbers = #tpu.dot_dimension_numbers<[1], [0], [0], [1], [0, 0, 1, 1], [], []>} : vector<16x32xbf16>, vector<32x64xbf16>, vector<16x64xf32> -> vector<16x64xf32>
    %c0_47 = arith.constant 0 : index
    %c0_48 = arith.constant 0 : index
    %c0_49 = arith.constant 0 : index
    %110 = vector.load %arg11[%c0_47, %c0_48, %c0_49] : memref<2x1x64xf32, #tpu.memory_space<vmem>>, vector<1x1x64xf32>
    %111 = vector.shape_cast %110 : vector<1x1x64xf32> to vector<1x64xf32>
    %112 = vector.broadcast %111 : vector<1x64xf32> to vector<16x64xf32>
    %113 = arith.addf %109, %112 : vector<16x64xf32>
    %cst_50 = arith.constant 5.000000e-01 : f32
    %114 = vector.broadcast %cst_50 : f32 to vector<16x64xf32>
    %115 = arith.mulf %114, %113 : vector<16x64xf32>
    %cst_51 = arith.constant 4.471500e-02 : f32
    %116 = vector.broadcast %cst_51 : f32 to vector<16x64xf32>
    %117 = arith.mulf %116, %113 : vector<16x64xf32>
    %118 = arith.mulf %117, %113 : vector<16x64xf32>
    %119 = arith.mulf %118, %113 : vector<16x64xf32>
    %120 = arith.addf %113, %119 : vector<16x64xf32>
    %cst_52 = arith.constant 0.797884583 : f32
    %121 = vector.broadcast %cst_52 : f32 to vector<16x64xf32>
    %122 = arith.mulf %121, %120 : vector<16x64xf32>
    %123 = math.tanh %122 : vector<16x64xf32>
    %cst_53 = arith.constant 1.000000e+00 : f32
    %124 = vector.broadcast %cst_53 : f32 to vector<16x64xf32>
    %125 = arith.addf %124, %123 : vector<16x64xf32>
    %126 = arith.mulf %115, %125 : vector<16x64xf32>
    %127 = arith.truncf %126 : vector<16x64xf32> to vector<16x64xbf16>
    %c0_54 = arith.constant 0 : index
    %c0_55 = arith.constant 0 : index
    %c0_56 = arith.constant 0 : index
    %128 = vector.load %arg12[%c0_54, %c0_55, %c0_56] : memref<2x64x32xbf16, #tpu.memory_space<vmem>>, vector<1x64x32xbf16>
    %129 = vector.shape_cast %128 : vector<1x64x32xbf16> to vector<64x32xbf16>
    %cst_57 = arith.constant dense<0.000000e+00> : vector<16x32xf32>
    %130 = tpu.matmul %127, %129, %cst_57 {dimension_numbers = #tpu.dot_dimension_numbers<[1], [0], [0], [1], [0, 0, 1, 1], [], []>} : vector<16x64xbf16>, vector<64x32xbf16>, vector<16x32xf32> -> vector<16x32xf32>
    %c0_58 = arith.constant 0 : index
    %c0_59 = arith.constant 0 : index
    %c0_60 = arith.constant 0 : index
    %131 = vector.load %arg13[%c0_58, %c0_59, %c0_60] : memref<2x1x32xf32, #tpu.memory_space<vmem>>, vector<1x1x32xf32>
    %132 = vector.shape_cast %131 : vector<1x1x32xf32> to vector<1x32xf32>
    %133 = vector.broadcast %132 : vector<1x32xf32> to vector<16x32xf32>
    %134 = arith.addf %130, %133 : vector<16x32xf32>
    %135 = arith.addf %105, %134 : vector<16x32xf32>
    %c0_61 = arith.constant 0 : index
    %c0_62 = arith.constant 0 : index
    %c0_63 = arith.constant 0 : index
    %136 = vector.load %arg14[%c0_61, %c0_62, %c0_63] : memref<2x1x32xf32, #tpu.memory_space<vmem>>, vector<1x1x32xf32>
    %137 = vector.shape_cast %136 : vector<1x1x32xf32> to vector<1x32xf32>
    %c0_64 = arith.constant 0 : index
    %c0_65 = arith.constant 0 : index
    %c0_66 = arith.constant 0 : index
    %138 = vector.load %arg15[%c0_64, %c0_65, %c0_66] : memref<2x1x32xf32, #tpu.memory_space<vmem>>, vector<1x1x32xf32>
    %139 = vector.shape_cast %138 : vector<1x1x32xf32> to vector<1x32xf32>
    %cst_67 = arith.constant dense<0.000000e+00> : vector<16xf32>
    %140 = vector.multi_reduction <add>, %135, %cst_67 [1] : vector<16x32xf32> to vector<16xf32>
    %141 = vector.shape_cast %140 : vector<16xf32> to vector<16x1xf32>
    %cst_68 = arith.constant 3.200000e+01 : f32
    %142 = vector.broadcast %cst_68 : f32 to vector<16x1xf32>
    %143 = arith.divf %141, %142 : vector<16x1xf32>
    %144 = vector.broadcast %143 : vector<16x1xf32> to vector<16x32xf32>
    %145 = arith.subf %135, %144 : vector<16x32xf32>
    %146 = arith.mulf %145, %145 : vector<16x32xf32>
    %cst_69 = arith.constant dense<0.000000e+00> : vector<16xf32>
    %147 = vector.multi_reduction <add>, %146, %cst_69 [1] : vector<16x32xf32> to vector<16xf32>
    %148 = vector.shape_cast %147 : vector<16xf32> to vector<16x1xf32>
    %cst_70 = arith.constant 3.200000e+01 : f32
    %149 = vector.broadcast %cst_70 : f32 to vector<16x1xf32>
    %150 = arith.divf %148, %149 : vector<16x1xf32>
    %151 = vector.broadcast %143 : vector<16x1xf32> to vector<16x32xf32>
    %152 = arith.subf %135, %151 : vector<16x32xf32>
    %cst_71 = arith.constant 9.99999996E-13 : f32
    %153 = vector.broadcast %cst_71 : f32 to vector<16x1xf32>
    %154 = arith.addf %150, %153 : vector<16x1xf32>
    %155 = math.rsqrt %154 : vector<16x1xf32>
    %156 = vector.broadcast %155 : vector<16x1xf32> to vector<16x32xf32>
    %157 = arith.mulf %152, %156 : vector<16x32xf32>
    %158 = vector.broadcast %137 : vector<1x32xf32> to vector<16x32xf32>
    %159 = arith.mulf %157, %158 : vector<16x32xf32>
    %160 = vector.broadcast %139 : vector<1x32xf32> to vector<16x32xf32>
    %161 = arith.addf %159, %160 : vector<16x32xf32>
    %162 = arith.truncf %161 : vector<16x32xf32> to vector<16x32xbf16>
    %c1 = arith.constant 1 : index
    %c0_72 = arith.constant 0 : index
    %c0_73 = arith.constant 0 : index
    %163 = vector.load %arg4[%c1, %c0_72, %c0_73] : memref<2x32x96xbf16, #tpu.memory_space<vmem>>, vector<1x32x96xbf16>
    %164 = vector.shape_cast %163 : vector<1x32x96xbf16> to vector<32x96xbf16>
    %cst_74 = arith.constant dense<0.000000e+00> : vector<16x96xf32>
    %165 = tpu.matmul %162, %164, %cst_74 {dimension_numbers = #tpu.dot_dimension_numbers<[1], [0], [0], [1], [0, 0, 1, 1], [], []>} : vector<16x32xbf16>, vector<32x96xbf16>, vector<16x96xf32> -> vector<16x96xf32>
    %c1_75 = arith.constant 1 : index
    %c0_76 = arith.constant 0 : index
    %c0_77 = arith.constant 0 : index
    %166 = vector.load %arg5[%c1_75, %c0_76, %c0_77] : memref<2x1x96xf32, #tpu.memory_space<vmem>>, vector<1x1x96xf32>
    %167 = vector.shape_cast %166 : vector<1x1x96xf32> to vector<1x96xf32>
    %168 = vector.broadcast %167 : vector<1x96xf32> to vector<16x96xf32>
    %169 = arith.addf %165, %168 : vector<16x96xf32>
    %170 = vector.extract_strided_slice %169 {offsets = [0, 0], sizes = [16, 16], strides = [1, 1]} : vector<16x96xf32> to vector<16x16xf32>
    %171 = vector.extract_strided_slice %169 {offsets = [0, 16], sizes = [16, 16], strides = [1, 1]} : vector<16x96xf32> to vector<16x16xf32>
    %172 = tpu.concatenate %170, %171 in 0 : vector<16x16xf32>, vector<16x16xf32> -> vector<32x16xf32>
    %173 = vector.shape_cast %172 : vector<32x16xf32> to vector<4x8x16xf32>
    %174 = arith.truncf %173 : vector<4x8x16xf32> to vector<4x8x16xbf16>
    %175 = vector.extract_strided_slice %169 {offsets = [0, 32], sizes = [16, 16], strides = [1, 1]} : vector<16x96xf32> to vector<16x16xf32>
    %176 = vector.extract_strided_slice %169 {offsets = [0, 48], sizes = [16, 16], strides = [1, 1]} : vector<16x96xf32> to vector<16x16xf32>
    %177 = tpu.concatenate %175, %176 in 0 : vector<16x16xf32>, vector<16x16xf32> -> vector<32x16xf32>
    %178 = vector.shape_cast %177 : vector<32x16xf32> to vector<4x8x16xf32>
    %179 = arith.truncf %178 : vector<4x8x16xf32> to vector<4x8x16xbf16>
    %180 = vector.extract_strided_slice %169 {offsets = [0, 64], sizes = [16, 16], strides = [1, 1]} : vector<16x96xf32> to vector<16x16xf32>
    %181 = vector.extract_strided_slice %169 {offsets = [0, 80], sizes = [16, 16], strides = [1, 1]} : vector<16x96xf32> to vector<16x16xf32>
    %182 = tpu.concatenate %180, %181 in 0 : vector<16x16xf32>, vector<16x16xf32> -> vector<32x16xf32>
    %183 = vector.shape_cast %182 : vector<32x16xf32> to vector<4x8x16xf32>
    %184 = arith.truncf %183 : vector<4x8x16xf32> to vector<4x8x16xbf16>
    "tpu.trace_start"() <{level = 10 : i32, message = "bqd,bkd->bqk"}> : () -> ()
    %cst_78 = arith.constant dense<0.000000e+00> : vector<4x8x8xf32>
    %185 = tpu.matmul %174, %179, %cst_78 {dimension_numbers = #tpu.dot_dimension_numbers<[2], [2], [1], [1], [0, 0, 0, 1, 1, 1], [0], [0]>} : vector<4x8x16xbf16>, vector<4x8x16xbf16>, vector<4x8x8xf32> -> vector<4x8x8xf32>
    "tpu.trace_stop"() : () -> ()
    %cst_79 = arith.constant 2.500000e-01 : f32
    %186 = vector.broadcast %cst_79 : f32 to vector<4x8x8xf32>
    %187 = arith.mulf %185, %186 : vector<4x8x8xf32>
    %188 = vector.broadcast %26 : vector<4x1x8xf32> to vector<4x8x8xf32>
    %189 = arith.addf %187, %188 : vector<4x8x8xf32>
    %cst_80 = arith.constant dense<0xFF800000> : vector<4x8xf32>
    %190 = vector.multi_reduction <maximumf>, %189, %cst_80 [2] : vector<4x8x8xf32> to vector<4x8xf32>
    %191 = vector.shape_cast %190 : vector<4x8xf32> to vector<4x8x1xf32>
    %192 = vector.broadcast %191 : vector<4x8x1xf32> to vector<4x8x8xf32>
    %193 = arith.subf %189, %192 : vector<4x8x8xf32>
    %194 = math.exp %193 : vector<4x8x8xf32>
    %cst_81 = arith.constant dense<0.000000e+00> : vector<4x8xf32>
    %195 = vector.multi_reduction <add>, %194, %cst_81 [2] : vector<4x8x8xf32> to vector<4x8xf32>
    %196 = vector.shape_cast %195 : vector<4x8xf32> to vector<4x8x1xf32>
    %197 = tpu.reciprocal %196 {approx = true} : vector<4x8x1xf32> -> vector<4x8x1xf32>
    %198 = vector.broadcast %197 : vector<4x8x1xf32> to vector<4x8x8xf32>
    %199 = arith.mulf %194, %198 : vector<4x8x8xf32>
    %200 = arith.truncf %199 : vector<4x8x8xf32> to vector<4x8x8xbf16>
    "tpu.trace_start"() <{level = 10 : i32, message = "bqk,bkd->bqd"}> : () -> ()
    %cst_82 = arith.constant dense<0.000000e+00> : vector<4x8x16xf32>
    %201 = tpu.matmul %200, %184, %cst_82 {dimension_numbers = #tpu.dot_dimension_numbers<[2], [1], [1], [2], [0, 0, 0, 1, 1, 2], [0], [0]>} : vector<4x8x8xbf16>, vector<4x8x16xbf16>, vector<4x8x16xf32> -> vector<4x8x16xf32>
    "tpu.trace_stop"() : () -> ()
    %202 = vector.shape_cast %201 : vector<4x8x16xf32> to vector<32x16xf32>
    %203 = vector.extract_strided_slice %202 {offsets = [0, 0], sizes = [16, 16], strides = [1, 1]} : vector<32x16xf32> to vector<16x16xf32>
    %204 = vector.extract_strided_slice %202 {offsets = [16, 0], sizes = [16, 16], strides = [1, 1]} : vector<32x16xf32> to vector<16x16xf32>
    %205 = tpu.concatenate %203, %204 in 1 : vector<16x16xf32>, vector<16x16xf32> -> vector<16x32xf32>
    %206 = arith.truncf %205 : vector<16x32xf32> to vector<16x32xbf16>
    %c1_83 = arith.constant 1 : index
    %c0_84 = arith.constant 0 : index
    %c0_85 = arith.constant 0 : index
    %207 = vector.load %arg6[%c1_83, %c0_84, %c0_85] : memref<2x32x32xbf16, #tpu.memory_space<vmem>>, vector<1x32x32xbf16>
    %208 = vector.shape_cast %207 : vector<1x32x32xbf16> to vector<32x32xbf16>
    %cst_86 = arith.constant dense<0.000000e+00> : vector<16x32xf32>
    %209 = tpu.matmul %206, %208, %cst_86 {dimension_numbers = #tpu.dot_dimension_numbers<[1], [0], [0], [1], [0, 0, 1, 1], [], []>} : vector<16x32xbf16>, vector<32x32xbf16>, vector<16x32xf32> -> vector<16x32xf32>
    %c1_87 = arith.constant 1 : index
    %c0_88 = arith.constant 0 : index
    %c0_89 = arith.constant 0 : index
    %210 = vector.load %arg7[%c1_87, %c0_88, %c0_89] : memref<2x1x32xf32, #tpu.memory_space<vmem>>, vector<1x1x32xf32>
    %211 = vector.shape_cast %210 : vector<1x1x32xf32> to vector<1x32xf32>
    %212 = vector.broadcast %211 : vector<1x32xf32> to vector<16x32xf32>
    %213 = arith.addf %209, %212 : vector<16x32xf32>
    %214 = arith.addf %161, %213 : vector<16x32xf32>
    %c1_90 = arith.constant 1 : index
    %c0_91 = arith.constant 0 : index
    %c0_92 = arith.constant 0 : index
    %215 = vector.load %arg8[%c1_90, %c0_91, %c0_92] : memref<2x1x32xf32, #tpu.memory_space<vmem>>, vector<1x1x32xf32>
    %216 = vector.shape_cast %215 : vector<1x1x32xf32> to vector<1x32xf32>
    %c1_93 = arith.constant 1 : index
    %c0_94 = arith.constant 0 : index
    %c0_95 = arith.constant 0 : index
    %217 = vector.load %arg9[%c1_93, %c0_94, %c0_95] : memref<2x1x32xf32, #tpu.memory_space<vmem>>, vector<1x1x32xf32>
    %218 = vector.shape_cast %217 : vector<1x1x32xf32> to vector<1x32xf32>
    %cst_96 = arith.constant dense<0.000000e+00> : vector<16xf32>
    %219 = vector.multi_reduction <add>, %214, %cst_96 [1] : vector<16x32xf32> to vector<16xf32>
    %220 = vector.shape_cast %219 : vector<16xf32> to vector<16x1xf32>
    %cst_97 = arith.constant 3.200000e+01 : f32
    %221 = vector.broadcast %cst_97 : f32 to vector<16x1xf32>
    %222 = arith.divf %220, %221 : vector<16x1xf32>
    %223 = vector.broadcast %222 : vector<16x1xf32> to vector<16x32xf32>
    %224 = arith.subf %214, %223 : vector<16x32xf32>
    %225 = arith.mulf %224, %224 : vector<16x32xf32>
    %cst_98 = arith.constant dense<0.000000e+00> : vector<16xf32>
    %226 = vector.multi_reduction <add>, %225, %cst_98 [1] : vector<16x32xf32> to vector<16xf32>
    %227 = vector.shape_cast %226 : vector<16xf32> to vector<16x1xf32>
    %cst_99 = arith.constant 3.200000e+01 : f32
    %228 = vector.broadcast %cst_99 : f32 to vector<16x1xf32>
    %229 = arith.divf %227, %228 : vector<16x1xf32>
    %230 = vector.broadcast %222 : vector<16x1xf32> to vector<16x32xf32>
    %231 = arith.subf %214, %230 : vector<16x32xf32>
    %cst_100 = arith.constant 9.99999996E-13 : f32
    %232 = vector.broadcast %cst_100 : f32 to vector<16x1xf32>
    %233 = arith.addf %229, %232 : vector<16x1xf32>
    %234 = math.rsqrt %233 : vector<16x1xf32>
    %235 = vector.broadcast %234 : vector<16x1xf32> to vector<16x32xf32>
    %236 = arith.mulf %231, %235 : vector<16x32xf32>
    %237 = vector.broadcast %216 : vector<1x32xf32> to vector<16x32xf32>
    %238 = arith.mulf %236, %237 : vector<16x32xf32>
    %239 = vector.broadcast %218 : vector<1x32xf32> to vector<16x32xf32>
    %240 = arith.addf %238, %239 : vector<16x32xf32>
    %241 = arith.truncf %240 : vector<16x32xf32> to vector<16x32xbf16>
    %c1_101 = arith.constant 1 : index
    %c0_102 = arith.constant 0 : index
    %c0_103 = arith.constant 0 : index
    %242 = vector.load %arg10[%c1_101, %c0_102, %c0_103] : memref<2x32x64xbf16, #tpu.memory_space<vmem>>, vector<1x32x64xbf16>
    %243 = vector.shape_cast %242 : vector<1x32x64xbf16> to vector<32x64xbf16>
    %cst_104 = arith.constant dense<0.000000e+00> : vector<16x64xf32>
    %244 = tpu.matmul %241, %243, %cst_104 {dimension_numbers = #tpu.dot_dimension_numbers<[1], [0], [0], [1], [0, 0, 1, 1], [], []>} : vector<16x32xbf16>, vector<32x64xbf16>, vector<16x64xf32> -> vector<16x64xf32>
    %c1_105 = arith.constant 1 : index
    %c0_106 = arith.constant 0 : index
    %c0_107 = arith.constant 0 : index
    %245 = vector.load %arg11[%c1_105, %c0_106, %c0_107] : memref<2x1x64xf32, #tpu.memory_space<vmem>>, vector<1x1x64xf32>
    %246 = vector.shape_cast %245 : vector<1x1x64xf32> to vector<1x64xf32>
    %247 = vector.broadcast %246 : vector<1x64xf32> to vector<16x64xf32>
    %248 = arith.addf %244, %247 : vector<16x64xf32>
    %cst_108 = arith.constant 5.000000e-01 : f32
    %249 = vector.broadcast %cst_108 : f32 to vector<16x64xf32>
    %250 = arith.mulf %249, %248 : vector<16x64xf32>
    %cst_109 = arith.constant 4.471500e-02 : f32
    %251 = vector.broadcast %cst_109 : f32 to vector<16x64xf32>
    %252 = arith.mulf %251, %248 : vector<16x64xf32>
    %253 = arith.mulf %252, %248 : vector<16x64xf32>
    %254 = arith.mulf %253, %248 : vector<16x64xf32>
    %255 = arith.addf %248, %254 : vector<16x64xf32>
    %cst_110 = arith.constant 0.797884583 : f32
    %256 = vector.broadcast %cst_110 : f32 to vector<16x64xf32>
    %257 = arith.mulf %256, %255 : vector<16x64xf32>
    %258 = math.tanh %257 : vector<16x64xf32>
    %cst_111 = arith.constant 1.000000e+00 : f32
    %259 = vector.broadcast %cst_111 : f32 to vector<16x64xf32>
    %260 = arith.addf %259, %258 : vector<16x64xf32>
    %261 = arith.mulf %250, %260 : vector<16x64xf32>
    %262 = arith.truncf %261 : vector<16x64xf32> to vector<16x64xbf16>
    %c1_112 = arith.constant 1 : index
    %c0_113 = arith.constant 0 : index
    %c0_114 = arith.constant 0 : index
    %263 = vector.load %arg12[%c1_112, %c0_113, %c0_114] : memref<2x64x32xbf16, #tpu.memory_space<vmem>>, vector<1x64x32xbf16>
    %264 = vector.shape_cast %263 : vector<1x64x32xbf16> to vector<64x32xbf16>
    %cst_115 = arith.constant dense<0.000000e+00> : vector<16x32xf32>
    %265 = tpu.matmul %262, %264, %cst_115 {dimension_numbers = #tpu.dot_dimension_numbers<[1], [0], [0], [1], [0, 0, 1, 1], [], []>} : vector<16x64xbf16>, vector<64x32xbf16>, vector<16x32xf32> -> vector<16x32xf32>
    %c1_116 = arith.constant 1 : index
    %c0_117 = arith.constant 0 : index
    %c0_118 = arith.constant 0 : index
    %266 = vector.load %arg13[%c1_116, %c0_117, %c0_118] : memref<2x1x32xf32, #tpu.memory_space<vmem>>, vector<1x1x32xf32>
    %267 = vector.shape_cast %266 : vector<1x1x32xf32> to vector<1x32xf32>
    %268 = vector.broadcast %267 : vector<1x32xf32> to vector<16x32xf32>
    %269 = arith.addf %265, %268 : vector<16x32xf32>
    %270 = arith.addf %240, %269 : vector<16x32xf32>
    %c1_119 = arith.constant 1 : index
    %c0_120 = arith.constant 0 : index
    %c0_121 = arith.constant 0 : index
    %271 = vector.load %arg14[%c1_119, %c0_120, %c0_121] : memref<2x1x32xf32, #tpu.memory_space<vmem>>, vector<1x1x32xf32>
    %272 = vector.shape_cast %271 : vector<1x1x32xf32> to vector<1x32xf32>
    %c1_122 = arith.constant 1 : index
    %c0_123 = arith.constant 0 : index
    %c0_124 = arith.constant 0 : index
    %273 = vector.load %arg15[%c1_122, %c0_123, %c0_124] : memref<2x1x32xf32, #tpu.memory_space<vmem>>, vector<1x1x32xf32>
    %274 = vector.shape_cast %273 : vector<1x1x32xf32> to vector<1x32xf32>
    %cst_125 = arith.constant dense<0.000000e+00> : vector<16xf32>
    %275 = vector.multi_reduction <add>, %270, %cst_125 [1] : vector<16x32xf32> to vector<16xf32>
    %276 = vector.shape_cast %275 : vector<16xf32> to vector<16x1xf32>
    %cst_126 = arith.constant 3.200000e+01 : f32
    %277 = vector.broadcast %cst_126 : f32 to vector<16x1xf32>
    %278 = arith.divf %276, %277 : vector<16x1xf32>
    %279 = vector.broadcast %278 : vector<16x1xf32> to vector<16x32xf32>
    %280 = arith.subf %270, %279 : vector<16x32xf32>
    %281 = arith.mulf %280, %280 : vector<16x32xf32>
    %cst_127 = arith.constant dense<0.000000e+00> : vector<16xf32>
    %282 = vector.multi_reduction <add>, %281, %cst_127 [1] : vector<16x32xf32> to vector<16xf32>
    %283 = vector.shape_cast %282 : vector<16xf32> to vector<16x1xf32>
    %cst_128 = arith.constant 3.200000e+01 : f32
    %284 = vector.broadcast %cst_128 : f32 to vector<16x1xf32>
    %285 = arith.divf %283, %284 : vector<16x1xf32>
    %286 = vector.broadcast %278 : vector<16x1xf32> to vector<16x32xf32>
    %287 = arith.subf %270, %286 : vector<16x32xf32>
    %cst_129 = arith.constant 9.99999996E-13 : f32
    %288 = vector.broadcast %cst_129 : f32 to vector<16x1xf32>
    %289 = arith.addf %285, %288 : vector<16x1xf32>
    %290 = math.rsqrt %289 : vector<16x1xf32>
    %291 = vector.broadcast %290 : vector<16x1xf32> to vector<16x32xf32>
    %292 = arith.mulf %287, %291 : vector<16x32xf32>
    %293 = vector.broadcast %272 : vector<1x32xf32> to vector<16x32xf32>
    %294 = arith.mulf %292, %293 : vector<16x32xf32>
    %295 = vector.broadcast %274 : vector<1x32xf32> to vector<16x32xf32>
    %296 = arith.addf %294, %295 : vector<16x32xf32>
    %297 = vector.shape_cast %296 : vector<16x32xf32> to vector<2x8x32xf32>
    %298 = vector.extract_strided_slice %297 {offsets = [0, 0, 0], sizes = [2, 1, 32], strides = [1, 1, 1]} : vector<2x8x32xf32> to vector<2x1x32xf32>
    %299 = vector.shape_cast %298 : vector<2x1x32xf32> to vector<2x32xf32>
    %c0_130 = arith.constant 0 : index
    %c0_131 = arith.constant 0 : index
    %300 = vector.load %arg16[%c0_130, %c0_131] : memref<2x32xf32, #tpu.memory_space<vmem>>, vector<2x32xf32>
    tpu.vector_store %arg16[%c0_130, %c0_131], %299 {strides = array<i32>} : memref<2x32xf32, #tpu.memory_space<vmem>>, vector<2x32xf32>,
    return
  }
}

</mosaic_0001>

<bundles_post_ra>
// kernel: tpu_custom_call.1
= control target key start
LH: loop header
LB: loop body
LE: loop exit
PB: predicated region body
PF: predicated region fallthrough
CT: control target
= control target key end

     0   :  { %s2972_s0 = inlined_call_operand.hbm [shape: f32[2,8,32], index: 0, kind: input, shape index: {}]   ;;  %s2973_s1 = inlined_call_operand.hbm [shape: f32[4,1,8], index: 1, kind: input, shape index: {}]   ;;  %s2974_s2 = inlined_call_operand.vmem [shape: f32[1,32], index: 2, kind: input, shape index: {}]   ;;  %s2975_s3 = inlined_call_operand.hbm [shape: f32[1,32], index: 3, kind: input, shape index: {}]   ;;  %s2976_s4 = inlined_call_operand.vmem [shape: bf16[2,32,96], index: 4, kind: input, shape index: {}]   ;;  %s2977_s5 = inlined_call_operand.vmem [shape: f32[2,1,96], index: 5, kind: input, shape index: {}]   ;;  %s2978_s6 = inlined_call_operand.vmem [shape: bf16[2,32,32], index: 6, kind: input, shape index: {}]   ;;  %s2979_s7 = inlined_call_operand.vmem [shape: f32[2,1,32], index: 7, kind: input, shape index: {}]   ;;  %s2980_s8 = inlined_call_operand.vmem [shape: f32[2,1,32], index: 8, kind: input, shape index: {}]   ;;  %s2981_s9 = inlined_call_operand.vmem [shape: f32[2,1,32], index: 9, kind: input, shape index: {}]   ;;  %s2982_s10 = inlined_call_operand.vmem [shape: bf16[2,32,64], index: 10, kind: input, shape index: {}]   ;;  %s2983_s11 = inlined_call_operand.vmem [shape: f32[2,1,64], index: 11, kind: input, shape index: {}]   ;;  %s2984_s12 = inlined_call_operand.vmem [shape: bf16[2,64,32], index: 12, kind: input, shape index: {}]   ;;  %s2985_s13 = inlined_call_operand.vmem [shape: f32[2,1,32], index: 13, kind: input, shape index: {}]   ;;  %s2986_s14 = inlined_call_operand.vmem [shape: f32[2,1,32], index: 14, kind: input, shape index: {}]   ;;  %s2987_s15 = inlined_call_operand.vmem [shape: f32[2,1,32], index: 15, kind: input, shape index: {}]   ;;  %s2988_s16 = inlined_call_operand.hbm [shape: f32[2,32], index: 16, kind: output, shape index: {}]  }
   0x1   :  { %2991 = sst [smem:[#allocation12_spill]] %s2972_s0 }
   0x2   :  { %2992 = sst [smem:[#allocation13_spill]] %s2988_s16 }
   0x3   :  { %21 = vsyncpa [#allocation3], 0 }
   0x4   :  { %22 = vsyncpa [#allocation6], 0 }
   0x5   :  { %23 = vsyncpa [#allocation4], 0  ;;  %s2467_s21 = smov [#allocation5]   ;;  %s2373_s25 = scalar_lea.hbm %s2973_s1, 64 }
   0x6   :  { %s41_s22 = sshll.u32 %s2467_s21, 4  ;;  %p2374_p0 = scmp.ne.s32.totalorder %s2973_s1, %s2373_s25  ;;  %s42_s22 = int_to_ptr.vmem [resolvable:$true] %s41_s22 }
   0x7   :  { %p2377_p1 = scmp.lt.u32.totalorder %s2373_s25, %s2973_s1 }
   0x9   :  { %p2379_p2 = pnand %p2377_p1, %p2374_p0 }
   0xb   :  { %2382 = shalt.err (!%p2379_p2)
}
   0xc   :  { %s2383_s30 = scalar_lea.vmem %s42_s22, 64  ;;  %p2388_p4 = scmp.lt.s32.totalorder %s42_s22, %s42_s22 }
   0xd   :  { %p2384_p3 = scmp.ne.s32.totalorder %s42_s22, %s2383_s30  ;;  %p2389_p5 = scmp.lt.s32.totalorder %s2383_s30, %s2383_s30 }
   0xf   :  { %p2390_p6 = por %p2389_p5, %p2388_p4 }
  0x11   :  { %p2391_p7 = pnand %p2390_p6, %p2384_p3 }
  0x13   :  { %2394 = shalt.err (!%p2391_p7)
}
  0x14   :  { %s2468_s0 = smov 16   ;;  %s2469_s17 = smov 1  }
  0x15   :  { %47 = dma.hbm_to_vmem [thread:$0]  %s2973_s1, 64, %s42_s22, [#allocation6], %s2468_s0, %s2468_s0, %s2469_s17  }
  0x16   :  { %s2470_s20 = smov [#allocation2]   ;;  %s2993_s25 = sld [smem:[#allocation12_spill]] }
  0x17   :  { %s29_s21 = sshll.u32 %s2470_s20, 4  ;;  %s30_s21 = int_to_ptr.vmem [resolvable:$true] %s29_s21 }
  0x1c   :  { %s2395_s26 = scalar_lea.hbm %s2993_s25, 256 }
  0x1d   :  { %p2396_p8 = scmp.ne.s32.totalorder %s2993_s25, %s2395_s26  ;;  %p2399_p9 = scmp.lt.u32.totalorder %s2395_s26, %s2993_s25 }
  0x1f   :  { %p2401_p10 = pnand %p2399_p9, %p2396_p8 }
  0x21   :  { %2404 = shalt.err (!%p2401_p10)
}
  0x22   :  { %s2405_s16 = scalar_lea.vmem %s30_s21, 256  ;;  %p2410_p12 = scmp.lt.s32.totalorder %s30_s21, %s30_s21 }
  0x23   :  { %p2406_p11 = scmp.ne.s32.totalorder %s30_s21, %s2405_s16  ;;  %p2411_p13 = scmp.lt.s32.totalorder %s2405_s16, %s2405_s16 }
  0x25   :  { %p2412_p0 = por %p2411_p13, %p2410_p12 }
  0x27   :  { %p2413_p1 = pnand %p2412_p0, %p2406_p11 }
  0x29   :  { %2416 = shalt.err (!%p2413_p1)
}
  0x2a   :  { %s2471_s1 = smov 128   ;;  %s2472_s22 = smov 8  }
  0x2b   :  { %35 = dma.hbm_to_vmem [thread:$0]  %s2993_s25, 256, %s30_s21, [#allocation3], %s2471_s1, %s2471_s1, %s2472_s22  }
  0x2c   :  { %s2473_s19 = smov [#allocation7]   ;;  %s2417_s26 = scalar_lea.hbm %s2975_s3, 16 }
  0x2d   :  { %s56_s20 = sshll.u32 %s2473_s19, 4  ;;  %p2418_p2 = scmp.ne.s32.totalorder %s2975_s3, %s2417_s26  ;;  %s57_s20 = int_to_ptr.vmem [resolvable:$true] %s56_s20 }
  0x2e   :  { %p2421_p3 = scmp.lt.u32.totalorder %s2417_s26, %s2975_s3 }
  0x30   :  { %p2423_p4 = pnand %p2421_p3, %p2418_p2 }
  0x32   :  { %2426 = shalt.err (!%p2423_p4)
}
  0x33   :  { %s2427_s30 = scalar_lea.vmem %s57_s20, 16  ;;  %s2431_s21 = scalar_lea.vmem %s57_s20, 32 }
  0x34   :  { %p2428_p5 = scmp.ne.s32.totalorder %s57_s20, %s2427_s30  ;;  %p2432_p6 = scmp.lt.s32.totalorder %s57_s20, %s57_s20 }
  0x35   :  { %p2433_p7 = scmp.lt.s32.totalorder %s2431_s21, %s2427_s30 }
  0x37   :  { %p2434_p8 = por %p2433_p7, %p2432_p6 }
  0x39   :  { %p2435_p9 = pnand %p2434_p8, %p2428_p5 }
  0x3b   :  { %2438 = shalt.err (!%p2435_p9)
}
  0x3c   :  { %59 = dma.hbm_to_vmem [thread:$0]  %s2975_s3, 16, %s57_s20, [#allocation6]  }
  0x3d   :  { %2461 = dma.done.wait [#allocation3], 256  }
  0x3e   :  { %2462 = vsyncadd [#allocation3], 4294967040 }
  0x3f   :  { %2463 = dma.done.wait [#allocation6], 80  }
  0x40   :  { %2464 = vsyncadd [#allocation6], 4294967216  ;;  %vm98_vm0 = vcmask 261120   ;;  %v94_v0 = vld [vmem:[#allocation2] sm:$0xff]  ;;  %v95_v1 = vld [vmem:[#allocation2 + $0x8] sm:$0xff]  ;;  %v2474_v15 = vmov 0.0  }
  0x41   :  { %v99_v2 = vsel %vm98_vm0, %v94_v0, 0.0  ;;  %v102_v3 = vsel %vm98_vm0, %v95_v1, 0.0  ;;  %v2293_v14 = vld [vmem:[%s2976_s4] sm:$0xff]   ;;  %2092 = vmatprep.subr.bf16.mxu1 %v2474_v15  ;;  %2106 = vmatprep.subr.bf16.mxu0 %v2474_v15  ;;  %v2294_v16 = vld [vmem:[%s2976_s4 + $0x8] sm:$0xff]   ;;  %vm2475_vm1 = vmmov 0   ;;  %s2477_s26 = smov 112  }
  0x42   :  { %100 = vadd.xlane.f32.xlu0 %v99_v2  ;;  %2093 = vmatpush3.bf16.msra.mxu1 %v2293_v14  ;;  %v1938_v25 = vld [vmem:[%s2974_s2] ss:$0 sm:$0xff]  ;;  %v1939_v29 = vld [vmem:[#allocation7] ss:$0 sm:$0xff]  ;;  %s2476_s2 = smov 96   ;;  %vm229_vm2 = vcmask 130048  }
  0x43   :  { %2096 = vmatprep.mubr.msk.bf16.mxu1 %vm2475_vm1, %v2474_v15  ;;  %2094 = vmatprep.subr.bf16.mxu1 %v2474_v15  ;;  %v1940_v34 = vld [vmem:[%s2977_s5] ss:$0 sm:$0xff]  ;;  %v2673_v58 = vld [vmem:[#allocation5] ss:$0 sm:$0xff]  ;;  %vm455_vm3 = vcmask 64512   ;;  %s2478_s27 = smov 64  }
  0x44   :  { %2108 = vmatprep.mubr.msk.bf16.mxu0 %vm2475_vm1, %v2474_v15  ;;  %vm509_vm4 = vcmask 1043456   ;;  %vm947_vm5 = vcmask 523264   ;;  %vm1917_vm6 = vcmask 1041409   ;;  %vm1920_vm7 = vcmask 254976  }
  0x46   :  { %103 = vadd.xlane.f32.xlu0 %v102_v3  ;;  %2095 = vmatpush3.bf16.msra.mxu1 %v2294_v16 }
  0x47   :  { %2100 = vmatprep.subr.bf16.mxu1 %v2474_v15 }
  0xcf   :  { %v101_v4 = vpop.xlane.xlu0 %100 }
  0xd0   :  { %v106_v5 = vmul.f32 0.03125, %v101_v4 }
  0xd2   :  { %v108_v6 = vsub.f32 %v94_v0, %v106_v5 }
  0xd3   :  { %v104_v7 = vpop.xlane.xlu0 %103 }
  0xd4   :  { %v107_v8 = vmul.f32 0.03125, %v104_v7  ;;  %v110_v9 = vmul.f32 %v108_v6, %v108_v6 }
  0xd6   :  { %v109_v10 = vsub.f32 %v95_v1, %v107_v8  ;;  %v112_v11 = vsel %vm98_vm0, %v110_v9, 0.0  ;;  %v2676_v1 = vld [vmem:[#allocation5 + $0x1] ss:$0 sm:$0xff] }
  0xd7   :  { %113 = vadd.xlane.f32.xlu1 %v112_v11  ;;  %v2682_v11 = vld [vmem:[#allocation5 + $0x2] ss:$0 sm:$0xff] }
  0xd8   :  { %v111_v12 = vmul.f32 %v109_v10, %v109_v10 }
  0xda   :  { %v115_v13 = vsel %vm98_vm0, %v111_v12, 0.0 }
  0xdb   :  { %116 = vadd.xlane.f32.xlu1 %v115_v13 }
 0x164   :  { %v114_v17 = vpop.xlane.xlu1 %113 }
 0x165   :  { %v118_v18 = vmul.f32 0.03125, %v114_v17 }
 0x167   :  { %v120_v19 = vadd.f32 1e-12, %v118_v18 }
 0x168   :  { %v117_v20 = vpop.xlane.xlu1 %116 }
 0x169   :  { %2313 = vrsqrt.f32 %v120_v19  ;;  %v119_v21 = vmul.f32 0.03125, %v117_v20  ;;  %v2684_v19 = vld [vmem:[#allocation5 + $0x3] ss:$0 sm:$0xff] }
 0x16b   :  { %v121_v22 = vadd.f32 1e-12, %v119_v21 }
 0x16d   :  { %2315 = vrsqrt.f32 %v121_v22 }
 0x173   :  { %v2314_v23 = vpop.eup %2313 }
 0x174   :  { %v124_v24 = vmul.f32 %v2314_v23, %v108_v6 }
 0x176   :  { %v132_v28 = vmul.f32 %v1938_v25, %v124_v24 }
 0x177   :  { %v2316_v26 = vpop.eup %2315 }
 0x178   :  { %v125_v27 = vmul.f32 %v2316_v26, %v109_v10  ;;  %v2624_v31 = vadd.f32 %v1939_v29, %v132_v28 }
 0x17a   :  { %v133_v30 = vmul.f32 %v1938_v25, %v125_v27 }
 0x17c   :  { %v2626_v32 = vadd.f32 %v1939_v29, %v133_v30 }
 0x17e   :  { %v146_v33 = vpack.c.bf16 %v2626_v32, %v2624_v31 }
 0x180   :  { %2097 = vmatmul.mubr.msk.bf16.vlgmr.msra.gmra.mrb[0].mxu1 %vm98_vm0, %v146_v33 }
 0x181   :  { %2102 = vmatprep.mubr.msk.bf16.mxu1 %vm2475_vm1, %v2474_v15 }
 0x253   :  { %v207_v35 = vpop.f32.mrb[0].mxu1 }
 0x254   :  { %v208_v36 = vadd.f32 %v1940_v34, %v207_v35  ;;  %v2098_v37 = vpop.f32.mrb[1].mxu1 }
 0x255   :  { %v210_v38 = vpop.f32.mrb[2].mxu1 }
 0x256   :  { %v222_v39 = vpack.c.bf16 %v208_v36, %v208_v36  ;;  %v211_v40 = vadd.f32 %v1940_v34, %v210_v38  ;;  %v2099_v41 = vpop.f32.mrb[3].mxu1 }
 0x258   :  { %v2273_v42 = vpack.i.bf16 %v211_v40, %v208_v36  ;;  %227 = vrot.lane.b32.xlu1 %v222_v39, %s2476_s2  ;;  %v2637_v43 = vpack.c.bf16 %v211_v40, %v211_v40 }
 0x25a   :  { %2274 = vrot.lane.b32.xlu0 %v2273_v42, %s2477_s26 }
 0x25c   :  { %277 = vrot.lane.b32.xlu1 %v2637_v43, %s2476_s2 }
 0x2ca   :  { %v228_v44 = vpop.permute.xlu1 %227 }
 0x2cb   :  { %v234_v45 = vsel %vm229_vm2, %v228_v44, 0 }
 0x2cc   :  { %2101 = vmatpush3.bf16.xpose.msra.mxu1 %v234_v45  ;;  %v2275_v46 = vpop.permute.xlu0 %2274 }
 0x2cd   :  { %v2277_v47 = vunpack.i.h.bf16 %v2275_v46  ;;  %v2276_v48 = vunpack.i.l.bf16 %v2275_v46  ;;  %2112 = vmatprep.subr.bf16.mxu1 %v2474_v15 }
 0x2ce   :  { %v278_v49 = vpop.permute.xlu1 %277 }
 0x2cf   :  { %v2644_v50 = vpack.c.bf16 %v2277_v47, %v2277_v47  ;;  %v2646_v51 = vpack.c.bf16 %v2276_v48, %v2276_v48  ;;  %v283_v52 = vsel %vm229_vm2, %v278_v49, 0 }
 0x2d0   :  { %2107 = vmatpush3.bf16.xpose.msra.mxu0 %v283_v52 }
 0x2d1   :  { %375 = vrot.lane.b32.xlu0 %v2644_v50, %s2476_s2  ;;  %326 = vrot.lane.b32.xlu1 %v2646_v51, %s2476_s2 }
 0x2d2   :  { %2118 = vmatprep.subr.bf16.mxu0 %v2474_v15 }
 0x2d3   :  { %2103 = vmatmul.mubr.msk.bf16.vlgmr.msra.gmra.mrb[4].mxu1 %vm229_vm2, %v222_v39 }
 0x2d4   :  { %2114 = vmatprep.mubr.msk.bf16.mxu1 %vm2475_vm1, %v2474_v15 }
 0x2d7   :  { %2109 = vmatmul.mubr.msk.bf16.vlgmr.msra.gmra.mrb[0].mxu0 %vm229_vm2, %v2637_v43 }
 0x2d8   :  { %2120 = vmatprep.mubr.msk.bf16.mxu0 %vm2475_vm1, %v2474_v15 }
 0x343   :  { %v376_v53 = vpop.permute.xlu0 %375  ;;  %v327_v54 = vpop.permute.xlu1 %326 }
 0x344   :  { %v381_v55 = vsel %vm229_vm2, %v376_v53, 0  ;;  %v332_v56 = vsel %vm229_vm2, %v327_v54, 0 }
 0x345   :  { %2113 = vmatpush3.bf16.xpose.msra.mxu1 %v332_v56  ;;  %2119 = vmatpush3.bf16.xpose.msra.mxu0 %v381_v55 }
 0x346   :  { %2124 = vmatprep.subr.bf16.mxu1 %v2474_v15  ;;  %2130 = vmatprep.subr.bf16.mxu0 %v2474_v15 }
 0x34c   :  { %2115 = vmatmul.mubr.msk.bf16.vlgmr.msra.gmra.mrb[8].mxu1 %vm229_vm2, %v2646_v51  ;;  %2121 = vmatmul.mubr.msk.bf16.vlgmr.msra.gmra.mrb[4].mxu0 %vm229_vm2, %v2644_v50 }
 0x34d   :  { %2126 = vmatprep.mubr.msk.bf16.mxu1 %vm2475_vm1, %v2474_v15  ;;  %2132 = vmatprep.mubr.msk.bf16.mxu0 %vm2475_vm1, %v2474_v15 }
 0x3a6   :  { %v270_v57 = vpop.f32.mrb[4].mxu1 }
 0x3a7   :  { %v423_v59 = vmul.f32 0.25, %v270_v57  ;;  %v2104_v60 = vpop.f32.mrb[5].mxu1 }
 0x3a8   :  { %v273_v61 = vpop.f32.mrb[6].mxu1 }
 0x3a9   :  { %v2105_v62 = vpop.f32.mrb[7].mxu1  ;;  %v451_v63 = vadd.f32 %v2673_v58, %v423_v59 }
 0x3aa   :  { %v319_v0 = vpop.f32.mrb[0].mxu0 }
 0x3ab   :  { %v424_v2 = vmul.f32 0.25, %v319_v0  ;;  %v2110_v3 = vpop.f32.mrb[1].mxu0  ;;  %v456_v4 = vsel %vm455_vm3, %v451_v63, -inf }
 0x3ac   :  { %v322_v5 = vpop.f32.mrb[2].mxu0  ;;  %457 = vmax.xlane.f32.xlu1 %v456_v4 }
 0x3ad   :  { %v2111_v6 = vpop.f32.mrb[3].mxu0  ;;  %v452_v7 = vadd.f32 %v2676_v1, %v424_v2 }
 0x3af   :  { %v459_v8 = vsel %vm455_vm3, %v452_v7, -inf }
 0x3b0   :  { %460 = vmax.xlane.f32.xlu0 %v459_v8 }
 0x3bd   :  { %504 = vrot.lane.b32.xlu1 %v222_v39, %s2478_s27 }
 0x41f   :  { %v368_v9 = vpop.f32.mrb[8].mxu1  ;;  %v417_v10 = vpop.f32.mrb[4].mxu0 }
 0x420   :  { %v425_v12 = vmul.f32 0.25, %v368_v9  ;;  %v426_v13 = vmul.f32 0.25, %v417_v10  ;;  %v2116_v14 = vpop.f32.mrb[9].mxu1  ;;  %v2122_v16 = vpop.f32.mrb[5].mxu0 }
 0x421   :  { %v371_v17 = vpop.f32.mrb[10].mxu1  ;;  %v420_v18 = vpop.f32.mrb[6].mxu0 }
 0x422   :  { %v2117_v20 = vpop.f32.mrb[11].mxu1  ;;  %v2123_v21 = vpop.f32.mrb[7].mxu0  ;;  %v453_v22 = vadd.f32 %v2682_v11, %v425_v12  ;;  %v454_v24 = vadd.f32 %v2684_v19, %v426_v13  ;;  %v2295_v13 = vld [vmem:[%s2978_s6] sm:$0xff]   ;;  %v2296_v17 = vld [vmem:[%s2978_s6 + $0x8] sm:$0xff]  }
 0x424   :  { %v462_v23 = vsel %vm455_vm3, %v453_v22, -inf  ;;  %v465_v25 = vsel %vm455_vm3, %v454_v24, -inf }
 0x425   :  { %463 = vmax.xlane.f32.xlu0 %v462_v23 }
 0x429   :  { %466 = vmax.xlane.f32.xlu0 %v465_v25 }
 0x439   :  { %v458_v26 = vpop.xlane.xlu1 %457 }
 0x43a   :  { %v468_v27 = vsub.f32 %v451_v63, %v458_v26 }
 0x43c   :  { %v472_v28 = vmul.f32 1.442695, %v468_v27 }
 0x43d   :  { %v461_v29 = vpop.xlane.xlu0 %460  ;;  %v505_v30 = vpop.permute.xlu1 %504 }
 0x43e   :  { %2317 = vpow2.f32 %v472_v28  ;;  %v469_v33 = vsub.f32 %v452_v7, %v461_v29  ;;  %v511_v34 = vsel %vm509_vm4, %v505_v30, 0 }
 0x43f   :  { %2125 = vmatpush3.bf16.msra.mxu1 %v511_v34 }
 0x440   :  { %v474_v35 = vmul.f32 1.442695, %v469_v33  ;;  %2136 = vmatprep.subr.bf16.mxu1 %v2474_v15 }
 0x442   :  { %2319 = vpow2.f32 %v474_v35 }
 0x448   :  { %v2318_v36 = vpop.eup %2317 }
 0x449   :  { %v480_v37 = vsel %vm455_vm3, %v2318_v36, 0.0 }
 0x44a   :  { %481 = vadd.xlane.f32.xlu1 %v480_v37 }
 0x44c   :  { %v2320_v38 = vpop.eup %2319 }
 0x44d   :  { %v483_v39 = vsel %vm455_vm3, %v2320_v38, 0.0 }
 0x44e   :  { %484 = vadd.xlane.f32.xlu0 %v483_v39 }
 0x4b2   :  { %v464_v40 = vpop.xlane.xlu0 %463 }
 0x4b3   :  { %v470_v41 = vsub.f32 %v453_v22, %v464_v40  ;;  %v1956_v40 = vld [vmem:[%s2979_s7] ss:$0 sm:$0xff] }
 0x4b5   :  { %v476_v42 = vmul.f32 1.442695, %v470_v41 }
 0x4b6   :  { %v467_v44 = vpop.xlane.xlu0 %466 }
 0x4b7   :  { %2321 = vpow2.f32 %v476_v42  ;;  %v471_v45 = vsub.f32 %v454_v24, %v467_v44 }
 0x4b9   :  { %v478_v46 = vmul.f32 1.442695, %v471_v45 }
 0x4bb   :  { %2323 = vpow2.f32 %v478_v46 }
 0x4c1   :  { %v2322_v47 = vpop.eup %2321 }
 0x4c2   :  { %v486_v48 = vsel %vm455_vm3, %v2322_v47, 0.0 }
 0x4c3   :  { %487 = vadd.xlane.f32.xlu1 %v486_v48 }
 0x4c5   :  { %v2324_v49 = vpop.eup %2323 }
 0x4c6   :  { %v489_v52 = vsel %vm455_vm3, %v2324_v49, 0.0 }
 0x4c7   :  { %490 = vadd.xlane.f32.xlu0 %v489_v52 }
 0x4d4   :  { %601 = vrot.lane.b32.xlu1 %v2646_v51, %s2478_s27 }
 0x4d7   :  { %v482_v53 = vpop.xlane.xlu1 %481 }
 0x4d8   :  { %2325 = vrcp.f32 %v482_v53  ;;  %649 = vrot.lane.b32.xlu1 %v2644_v50, %s2478_s27 }
 0x4db   :  { %v485_v57 = vpop.xlane.xlu0 %484 }
 0x4dc   :  { %2327 = vrcp.f32 %v485_v57 }
 0x4dd   :  { %553 = vrot.lane.b32.xlu0 %v2637_v43, %s2478_s27 }
 0x4e2   :  { %v2326_v54 = vpop.eup %2325 }
 0x4e3   :  { %v496_v55 = vmul.f32 %v2326_v54, %v2318_v36 }
 0x4e5   :  { %v500_v56 = vpack.c.bf16 %v496_v55, %v496_v55 }
 0x4e6   :  { %v2328_v51 = vpop.eup %2327 }
 0x4e7   :  { %2127 = vmatmul.mubr.msk.bf16.vlgmr.msra.gmra.mrb[12].mxu1 %vm455_vm3, %v500_v56  ;;  %v497_v43 = vmul.f32 %v2328_v51, %v2320_v38 }
 0x4e8   :  { %2138 = vmatprep.mubr.msk.bf16.mxu1 %vm2475_vm1, %v2474_v15 }
 0x4e9   :  { %v501_v3 = vpack.c.bf16 %v497_v43, %v497_v43  ;;  %v2298_v43 = vld [vmem:[%s2982_s10 + $0x8] sm:$0xff]  }
 0x550   :  { %v488_v59 = vpop.xlane.xlu1 %487 }
 0x551   :  { %2329 = vrcp.f32 %v488_v59 }
 0x554   :  { %v602_v60 = vpop.permute.xlu1 %601  ;;  %v491_v61 = vpop.xlane.xlu0 %490 }
 0x555   :  { %v607_v50 = vsel %vm509_vm4, %v602_v60, 0  ;;  %2331 = vrcp.f32 %v491_v61 }
 0x556   :  { %2137 = vmatpush3.bf16.msra.mxu1 %v607_v50 }
 0x557   :  { %2148 = vmatprep.subr.bf16.mxu1 %v2474_v15 }
 0x558   :  { %v554_v62 = vpop.permute.xlu0 %553  ;;  %v650_v0 = vpop.permute.xlu1 %649 }
 0x559   :  { %v559_v63 = vsel %vm509_vm4, %v554_v62, 0  ;;  %v655_v5 = vsel %vm509_vm4, %v650_v0, 0 }
 0x55a   :  { %2131 = vmatpush3.bf16.msra.mxu0 %v559_v63 }
 0x55b   :  { %v2330_v2 = vpop.eup %2329  ;;  %2142 = vmatprep.subr.bf16.mxu0 %v2474_v15 }
 0x55c   :  { %v498_v4 = vmul.f32 %v2330_v2, %v2322_v47 }
 0x55d   :  { %2133 = vmatmul.mubr.msk.bf16.vlgmr.msra.gmra.mrb[8].mxu0 %vm455_vm3, %v501_v3 }
 0x55e   :  { %2143 = vmatpush3.bf16.msra.mxu0 %v655_v5  ;;  %v502_v6 = vpack.c.bf16 %v498_v4, %v498_v4  ;;  %2144 = vmatprep.mubr.msk.bf16.mxu0 %vm2475_vm1, %v2474_v15 }
 0x55f   :  { %v2332_v7 = vpop.eup %2331  ;;  %2156 = vmatprep.subr.bf16.mxu0 %v2474_v15 }
 0x560   :  { %v499_v8 = vmul.f32 %v2332_v7, %v2324_v49  ;;  %2139 = vmatmul.mubr.msk.bf16.vlgmr.msra.gmra.mrb[16].mxu1 %vm455_vm3, %v502_v6  ;;  %v1960_v7 = vld [vmem:[%s2980_s8] ss:$0 sm:$0xff] }
 0x561   :  { %2152 = vmatprep.mubr.msk.bf16.mxu1 %vm2475_vm1, %v2474_v15  ;;  %2149 = vmatpush3.bf16.msra.mxu1 %v2295_v13 }
 0x562   :  { %v503_v9 = vpack.c.bf16 %v499_v8, %v499_v8  ;;  %2150 = vmatprep.subr.bf16.mxu1 %v2474_v15 }
 0x565   :  { %2145 = vmatmul.mubr.msk.bf16.vlgmr.msra.gmra.mrb[12].mxu0 %vm455_vm3, %v503_v9  ;;  %2151 = vmatpush3.bf16.msra.mxu1 %v2296_v17 }
 0x566   :  { %2160 = vmatprep.mubr.msk.bf16.mxu0 %vm2475_vm1, %v2474_v15  ;;  %2164 = vmatprep.subr.bf16.mxu1 %v2474_v15 }
 0x5ba   :  { %v547_v10 = vpop.f32.mrb[12].mxu1 }
 0x5bb   :  { %v2128_v12 = vpop.f32.mrb[13].mxu1 }
 0x5bc   :  { %v550_v14 = vpop.f32.mrb[14].mxu1  ;;  %v1961_v12 = vld [vmem:[%s2981_s9] ss:$0 sm:$0xff] }
 0x5bd   :  { %v2129_v16 = vpop.f32.mrb[15].mxu1 }
 0x630   :  { %v595_v18 = vpop.f32.mrb[8].mxu0 }
 0x631   :  { %v2134_v20 = vpop.f32.mrb[9].mxu0 }
 0x632   :  { %v598_v21 = vpop.f32.mrb[10].mxu0  ;;  %v2300_v20 = vld [vmem:[%s2984_s12 + $0x8] sm:$0xff]  }
 0x633   :  { %v2135_v22 = vpop.f32.mrb[11].mxu0  ;;  %v643_v23 = vpop.f32.mrb[16].mxu1  ;;  %v2301_v21 = vld [vmem:[%s2984_s12 + $0x10] sm:$0xff]  }
 0x634   :  { %v2140_v24 = vpop.f32.mrb[17].mxu1  ;;  %v2302_v22 = vld [vmem:[%s2984_s12 + $0x18] sm:$0xff]  }
 0x635   :  { %v646_v25 = vpop.f32.mrb[18].mxu1 }
 0x636   :  { %v2141_v26 = vpop.f32.mrb[19].mxu1 }
 0x638   :  { %v691_v27 = vpop.f32.mrb[12].mxu0 }
 0x639   :  { %v2278_v28 = vpack.i.bf16 %v691_v27, %v643_v23  ;;  %v2146_v29 = vpop.f32.mrb[13].mxu0  ;;  %v1962_v23 = vld [vmem:[%s2983_s11] ss:$0 sm:$0xff] }
 0x63a   :  { %v694_v30 = vpop.f32.mrb[14].mxu0 }
 0x63b   :  { %v2147_v33 = vpop.f32.mrb[15].mxu0  ;;  %2279 = vrot.lane.b32.xlu1 %v2278_v28, %s2468_s0 }
 0x6ad   :  { %v2280_v34 = vpop.permute.xlu1 %2279 }
 0x6ae   :  { %v2282_v35 = vunpack.i.h.bf16 %v2280_v34  ;;  %v2281_v36 = vunpack.i.l.bf16 %v2280_v34 }
 0x6b0   :  { %v706_v37 = vsel %vm229_vm2, %v595_v18, %v2282_v35  ;;  %v705_v38 = vsel %vm229_vm2, %v547_v10, %v2281_v36  ;;  %v2299_v18 = vld [vmem:[%s2984_s12] sm:$0xff]  }
 0x6b1   :  { %v707_v39 = vpack.c.bf16 %v706_v37, %v705_v38 }
 0x6b3   :  { %2153 = vmatmul.mubr.msk.bf16.vlgmr.msra.gmra.mrb[20].mxu1 %vm98_vm0, %v707_v39 }
 0x6b4   :  { %2172 = vmatprep.mubr.msk.bf16.mxu1 %vm2475_vm1, %v2474_v15  ;;  %2165 = vmatpush3.bf16.msra.mxu1 %v2299_v18 }
 0x6b5   :  { %2166 = vmatprep.subr.bf16.mxu1 %v2474_v15 }
 0x6b8   :  { %2167 = vmatpush3.bf16.msra.mxu1 %v2300_v20  ;;  %v1972_v20 = vld [vmem:[%s2986_s14] ss:$0 sm:$0xff] }
 0x6b9   :  { %2168 = vmatprep.subr.bf16.mxu1 %v2474_v15 }
 0x6bc   :  { %2169 = vmatpush3.bf16.msra.mxu1 %v2301_v21 }
 0x6bd   :  { %2170 = vmatprep.subr.bf16.mxu1 %v2474_v15 }
 0x6c0   :  { %2171 = vmatpush3.bf16.msra.mxu1 %v2302_v22 }
 0x6c1   :  { %2190 = vmatprep.subr.bf16.mxu1 %v2474_v15 }
 0x786   :  { %v768_v41 = vpop.f32.mrb[20].mxu1 }
 0x787   :  { %v769_v42 = vadd.f32 %v1956_v40, %v768_v41  ;;  %v2154_v44 = vpop.f32.mrb[21].mxu1 }
 0x788   :  { %v771_v45 = vpop.f32.mrb[22].mxu1 }
 0x789   :  { %v772_v46 = vadd.f32 %v1956_v40, %v771_v45  ;;  %v2155_v47 = vpop.f32.mrb[23].mxu1  ;;  %v775_v48 = vadd.f32 %v769_v42, %v2624_v31 }
 0x78b   :  { %v779_v49 = vsel %vm98_vm0, %v775_v48, 0.0  ;;  %v776_v52 = vadd.f32 %v772_v46, %v2626_v32  ;;  %v2297_v32 = vld [vmem:[%s2982_s10] sm:$0xff]  }
 0x78c   :  { %780 = vadd.xlane.f32.xlu0 %v779_v49  ;;  %2157 = vmatpush3.bf16.msra.mxu0 %v2297_v32 }
 0x78d   :  { %v782_v53 = vsel %vm98_vm0, %v776_v52, 0.0  ;;  %2158 = vmatprep.subr.bf16.mxu0 %v2474_v15 }
 0x78e   :  { %783 = vadd.xlane.f32.xlu1 %v782_v53 }
 0x790   :  { %2159 = vmatpush3.bf16.msra.mxu0 %v2298_v43 }
 0x791   :  { %2176 = vmatprep.subr.bf16.mxu0 %v2474_v15 }
 0x819   :  { %v781_v54 = vpop.xlane.xlu0 %780 }
 0x81a   :  { %v785_v55 = vmul.f32 0.03125, %v781_v54  ;;  %v1966_v54 = vld [vmem:[%s2985_s13] ss:$0 sm:$0xff] }
 0x81b   :  { %v784_v56 = vpop.xlane.xlu1 %783 }
 0x81c   :  { %v787_v57 = vsub.f32 %v775_v48, %v785_v55  ;;  %v786_v59 = vmul.f32 0.03125, %v784_v56 }
 0x81e   :  { %v788_v51 = vsub.f32 %v776_v52, %v786_v59  ;;  %v789_v60 = vmul.f32 %v787_v57, %v787_v57 }
 0x820   :  { %v791_v61 = vsel %vm98_vm0, %v789_v60, 0.0  ;;  %v790_v50 = vmul.f32 %v788_v51, %v788_v51 }
 0x821   :  { %792 = vadd.xlane.f32.xlu0 %v791_v61 }
 0x822   :  { %v794_v31 = vsel %vm98_vm0, %v790_v50, 0.0 }
 0x825   :  { %795 = vadd.xlane.f32.xlu0 %v794_v31 }
 0x8ae   :  { %v793_v62 = vpop.xlane.xlu0 %792 }
 0x8af   :  { %v797_v63 = vmul.f32 0.03125, %v793_v62 }
 0x8b1   :  { %v799_v0 = vadd.f32 1e-12, %v797_v63 }
 0x8b2   :  { %v796_v2 = vpop.xlane.xlu0 %795 }
 0x8b3   :  { %2333 = vrsqrt.f32 %v799_v0  ;;  %v798_v3 = vmul.f32 0.03125, %v796_v2 }
 0x8b5   :  { %v800_v4 = vadd.f32 1e-12, %v798_v3 }
 0x8b7   :  { %2335 = vrsqrt.f32 %v800_v4 }
 0x8bd   :  { %v2334_v5 = vpop.eup %2333 }
 0x8be   :  { %v803_v6 = vmul.f32 %v2334_v5, %v787_v57 }
 0x8c0   :  { %v811_v9 = vmul.f32 %v1960_v7, %v803_v6 }
 0x8c1   :  { %v2336_v8 = vpop.eup %2335 }
 0x8c2   :  { %v804_v10 = vmul.f32 %v2336_v8, %v788_v51  ;;  %v819_v14 = vadd.f32 %v1961_v12, %v811_v9  ;;  %v2303_v8 = vld [vmem:[%s2976_s4 + $0x10] sm:$0xff]   ;;  %v2304_v9 = vld [vmem:[%s2976_s4 + $0x18] sm:$0xff]  }
 0x8c4   :  { %v812_v13 = vmul.f32 %v1960_v7, %v804_v10 }
 0x8c6   :  { %v820_v16 = vadd.f32 %v1961_v12, %v812_v13 }
 0x8c8   :  { %v821_v17 = vpack.c.bf16 %v820_v16, %v819_v14 }
 0x8ca   :  { %2161 = vmatmul.mubr.msk.bf16.vlgmr.msra.gmra.mrb[16].mxu0 %vm98_vm0, %v821_v17 }
 0x8cb   :  { %2180 = vmatprep.mubr.msk.bf16.mxu0 %vm2475_vm1, %v2474_v15  ;;  %2177 = vmatpush3.bf16.msra.mxu0 %v2303_v8 }
 0x8cc   :  { %2178 = vmatprep.subr.bf16.mxu0 %v2474_v15 }
 0x8cf   :  { %2179 = vmatpush3.bf16.msra.mxu0 %v2304_v9 }
 0x8d0   :  { %2184 = vmatprep.subr.bf16.mxu0 %v2474_v15 }
 0x99d   :  { %v882_v24 = vpop.f32.mrb[16].mxu0 }
 0x99e   :  { %v883_v25 = vadd.f32 %v1962_v23, %v882_v24  ;;  %v2162_v26 = vpop.f32.mrb[17].mxu0 }
 0x99f   :  { %v885_v27 = vpop.f32.mrb[18].mxu0 }
 0x9a0   :  { %v891_v28 = vmul.f32 0.044715, %v883_v25  ;;  %v886_v29 = vadd.f32 %v1962_v23, %v885_v27  ;;  %v2163_v30 = vpop.f32.mrb[19].mxu0  ;;  %v889_v46 = vmul.f32 0.5, %v883_v25 }
 0x9a1   :  { %v1979_v30 = vld [vmem:[%s2977_s5 + $0x1] ss:$0 sm:$0xff] }
 0x9a2   :  { %v893_v33 = vmul.f32 %v891_v28, %v883_v25  ;;  %v892_v34 = vmul.f32 0.044715, %v886_v29  ;;  %v890_v47 = vmul.f32 0.5, %v886_v29 }
 0x9a4   :  { %v895_v35 = vmul.f32 %v893_v33, %v883_v25  ;;  %v894_v36 = vmul.f32 %v892_v34, %v886_v29 }
 0x9a6   :  { %v897_v37 = vadd.f32 %v895_v35, %v883_v25  ;;  %v896_v38 = vmul.f32 %v894_v36, %v886_v29  ;;  %v1973_v25 = vld [vmem:[%s2987_s15] ss:$0 sm:$0xff] }
 0x9a8   :  { %v899_v39 = vmul.f32 0.7978846, %v897_v37  ;;  %v898_v40 = vadd.f32 %v896_v38, %v886_v29 }
 0x9aa   :  { %2337 = vtanh.f32 %v899_v39  ;;  %v900_v41 = vmul.f32 0.7978846, %v898_v40 }
 0x9ac   :  { %2339 = vtanh.f32 %v900_v41 }
 0x9b4   :  { %v2338_v42 = vpop.eup %2337 }
 0x9b5   :  { %v903_v44 = vadd.f32 1.0, %v2338_v42 }
 0x9b6   :  { %v2340_v45 = vpop.eup %2339 }
 0x9b7   :  { %v904_v48 = vadd.f32 1.0, %v2340_v45  ;;  %v905_v49 = vmul.f32 %v903_v44, %v889_v46 }
 0x9b9   :  { %v906_v52 = vmul.f32 %v904_v48, %v890_v47 }
 0x9bb   :  { %v907_v53 = vpack.c.bf16 %v906_v52, %v905_v49 }
 0x9bd   :  { %2173 = vmatmul.mubr.msk.bf16.vlgmr.msra.gmra.mrb[24].mxu1 %vm947_vm5, %v907_v53 }
 0x9be   :  { %2192 = vmatprep.mubr.msk.bf16.mxu1 %vm2475_vm1, %v2474_v15 }
 0xa90   :  { %v985_v55 = vpop.f32.mrb[24].mxu1 }
 0xa91   :  { %v986_v56 = vadd.f32 %v1966_v54, %v985_v55  ;;  %v2174_v57 = vpop.f32.mrb[25].mxu1 }
 0xa92   :  { %v988_v59 = vpop.f32.mrb[26].mxu1 }
 0xa93   :  { %v989_v51 = vadd.f32 %v1966_v54, %v988_v59  ;;  %v2175_v60 = vpop.f32.mrb[27].mxu1  ;;  %v992_v61 = vadd.f32 %v986_v56, %v819_v14 }
 0xa95   :  { %v996_v50 = vsel %vm98_vm0, %v992_v61, 0.0  ;;  %v993_v31 = vadd.f32 %v989_v51, %v820_v16 }
 0xa96   :  { %997 = vadd.xlane.f32.xlu0 %v996_v50 }
 0xa97   :  { %v999_v32 = vsel %vm98_vm0, %v993_v31, 0.0 }
 0xa98   :  { %1000 = vadd.xlane.f32.xlu1 %v999_v32 }
 0xb23   :  { %v998_v43 = vpop.xlane.xlu0 %997 }
 0xb24   :  { %v1002_v62 = vmul.f32 0.03125, %v998_v43 }
 0xb25   :  { %v1001_v63 = vpop.xlane.xlu1 %1000 }
 0xb26   :  { %v1004_v0 = vsub.f32 %v992_v61, %v1002_v62  ;;  %v1003_v2 = vmul.f32 0.03125, %v1001_v63 }
 0xb28   :  { %v1005_v3 = vsub.f32 %v993_v31, %v1003_v2  ;;  %v1006_v4 = vmul.f32 %v1004_v0, %v1004_v0 }
 0xb2a   :  { %v1008_v5 = vsel %vm98_vm0, %v1006_v4, 0.0  ;;  %v1007_v6 = vmul.f32 %v1005_v3, %v1005_v3 }
 0xb2b   :  { %1009 = vadd.xlane.f32.xlu0 %v1008_v5 }
 0xb2c   :  { %v1011_v7 = vsel %vm98_vm0, %v1007_v6, 0.0 }
 0xb2d   :  { %1012 = vadd.xlane.f32.xlu1 %v1011_v7 }
 0xbb8   :  { %v1010_v10 = vpop.xlane.xlu0 %1009 }
 0xbb9   :  { %v1014_v12 = vmul.f32 0.03125, %v1010_v10 }
 0xbba   :  { %v1013_v13 = vpop.xlane.xlu1 %1012 }
 0xbbb   :  { %v1016_v14 = vadd.f32 1e-12, %v1014_v12  ;;  %v1015_v16 = vmul.f32 0.03125, %v1013_v13 }
 0xbbd   :  { %2341 = vrsqrt.f32 %v1016_v14  ;;  %v1017_v17 = vadd.f32 1e-12, %v1015_v16 }
 0xbbf   :  { %2343 = vrsqrt.f32 %v1017_v17 }
 0xbc7   :  { %v2342_v18 = vpop.eup %2341 }
 0xbc8   :  { %v1020_v21 = vmul.f32 %v2342_v18, %v1004_v0 }
 0xbc9   :  { %v2344_v22 = vpop.eup %2343 }
 0xbca   :  { %v1028_v23 = vmul.f32 %v1972_v20, %v1020_v21  ;;  %v1021_v24 = vmul.f32 %v2344_v22, %v1005_v3 }
 0xbcc   :  { %v1029_v26 = vmul.f32 %v1972_v20, %v1021_v24  ;;  %v2803_v27 = vadd.f32 %v1973_v25, %v1028_v23 }
 0xbce   :  { %v2805_v28 = vadd.f32 %v1973_v25, %v1029_v26 }
 0xbd0   :  { %v1038_v29 = vpack.c.bf16 %v2805_v28, %v2803_v27 }
 0xbd2   :  { %2181 = vmatmul.mubr.msk.bf16.vlgmr.msra.gmra.mrb[20].mxu0 %vm98_vm0, %v1038_v29 }
 0xbd3   :  { %2186 = vmatprep.mubr.msk.bf16.mxu0 %vm2475_vm1, %v2474_v15 }
 0xca5   :  { %v1101_v33 = vpop.f32.mrb[20].mxu0 }
 0xca6   :  { %v1102_v34 = vadd.f32 %v1979_v30, %v1101_v33  ;;  %v2182_v35 = vpop.f32.mrb[21].mxu0 }
 0xca7   :  { %v1104_v36 = vpop.f32.mrb[22].mxu0 }
 0xca8   :  { %v1116_v37 = vpack.c.bf16 %v1102_v34, %v1102_v34  ;;  %v1105_v38 = vadd.f32 %v1979_v30, %v1104_v36  ;;  %v2183_v39 = vpop.f32.mrb[23].mxu0 }
 0xcaa   :  { %v2283_v40 = vpack.i.bf16 %v1105_v38, %v1102_v34  ;;  %1121 = vrot.lane.b32.xlu1 %v1116_v37, %s2476_s2  ;;  %v2816_v41 = vpack.c.bf16 %v1105_v38, %v1105_v38 }
 0xcac   :  { %2284 = vrot.lane.b32.xlu0 %v2283_v40, %s2477_s26 }
 0xcae   :  { %1170 = vrot.lane.b32.xlu1 %v2816_v41, %s2476_s2 }
 0xd1c   :  { %v1122_v42 = vpop.permute.xlu1 %1121 }
 0xd1d   :  { %v1127_v44 = vsel %vm229_vm2, %v1122_v42, 0 }
 0xd1e   :  { %2185 = vmatpush3.bf16.xpose.msra.mxu0 %v1127_v44  ;;  %v2285_v45 = vpop.permute.xlu0 %2284 }
 0xd1f   :  { %v2287_v46 = vunpack.i.h.bf16 %v2285_v45  ;;  %v2286_v47 = vunpack.i.l.bf16 %v2285_v45  ;;  %2196 = vmatprep.subr.bf16.mxu0 %v2474_v15 }
 0xd20   :  { %v1171_v48 = vpop.permute.xlu1 %1170 }
 0xd21   :  { %v2823_v49 = vpack.c.bf16 %v2287_v46, %v2287_v46  ;;  %v2825_v52 = vpack.c.bf16 %v2286_v47, %v2286_v47  ;;  %v1176_v53 = vsel %vm229_vm2, %v1171_v48, 0 }
 0xd22   :  { %2191 = vmatpush3.bf16.xpose.msra.mxu1 %v1176_v53 }
 0xd23   :  { %1268 = vrot.lane.b32.xlu0 %v2823_v49, %s2476_s2  ;;  %1219 = vrot.lane.b32.xlu1 %v2825_v52, %s2476_s2  ;;  %s2479_s2 = smov [#allocation8]  }
 0xd24   :  { %2202 = vmatprep.subr.bf16.mxu1 %v2474_v15  ;;  %s1928_s26 = sshll.u32 %s2479_s2, 4  ;;  %s1929_s26 = int_to_ptr.vmem [resolvable:$true] %s1928_s26 }
 0xd25   :  { %2187 = vmatmul.mubr.msk.bf16.vlgmr.msra.gmra.mrb[24].mxu0 %vm229_vm2, %v1116_v37  ;;  %p2444_p11 = scmp.lt.s32.totalorder %s1929_s26, %s1929_s26 }
 0xd26   :  { %2198 = vmatprep.mubr.msk.bf16.mxu0 %vm2475_vm1, %v2474_v15 }
 0xd29   :  { %2193 = vmatmul.mubr.msk.bf16.vlgmr.msra.gmra.mrb[28].mxu1 %vm229_vm2, %v2816_v41 }
 0xd2a   :  { %2204 = vmatprep.mubr.msk.bf16.mxu1 %vm2475_vm1, %v2474_v15 }
 0xd95   :  { %v1269_v54 = vpop.permute.xlu0 %1268  ;;  %v1220_v55 = vpop.permute.xlu1 %1219 }
 0xd96   :  { %v1274_v56 = vsel %vm229_vm2, %v1269_v54, 0  ;;  %v1225_v57 = vsel %vm229_vm2, %v1220_v55, 0 }
 0xd97   :  { %2197 = vmatpush3.bf16.xpose.msra.mxu0 %v1225_v57  ;;  %2203 = vmatpush3.bf16.xpose.msra.mxu1 %v1274_v56 }
 0xd98   :  { %2208 = vmatprep.subr.bf16.mxu0 %v2474_v15  ;;  %2214 = vmatprep.subr.bf16.mxu1 %v2474_v15 }
 0xd9e   :  { %2199 = vmatmul.mubr.msk.bf16.vlgmr.msra.gmra.mrb[28].mxu0 %vm229_vm2, %v2825_v52  ;;  %2205 = vmatmul.mubr.msk.bf16.vlgmr.msra.gmra.mrb[32].mxu1 %vm229_vm2, %v2823_v49 }
 0xd9f   :  { %2210 = vmatprep.mubr.msk.bf16.mxu0 %vm2475_vm1, %v2474_v15  ;;  %2216 = vmatprep.mubr.msk.bf16.mxu1 %vm2475_vm1, %v2474_v15 }
 0xdf8   :  { %v1163_v59 = vpop.f32.mrb[24].mxu0 }
 0xdf9   :  { %v1316_v51 = vmul.f32 0.25, %v1163_v59  ;;  %v2188_v60 = vpop.f32.mrb[25].mxu0 }
 0xdfa   :  { %v1166_v61 = vpop.f32.mrb[26].mxu0 }
 0xdfb   :  { %v2189_v50 = vpop.f32.mrb[27].mxu0  ;;  %v1320_v31 = vadd.f32 %v2673_v58, %v1316_v51 }
 0xdfc   :  { %v1212_v32 = vpop.f32.mrb[28].mxu1 }
 0xdfd   :  { %v1317_v43 = vmul.f32 0.25, %v1212_v32  ;;  %v2194_v62 = vpop.f32.mrb[29].mxu1  ;;  %v1324_v63 = vsel %vm455_vm3, %v1320_v31, -inf }
 0xdfe   :  { %1325 = vmax.xlane.f32.xlu1 %v1324_v63  ;;  %v1215_v0 = vpop.f32.mrb[30].mxu1 }
 0xdff   :  { %v2195_v2 = vpop.f32.mrb[31].mxu1  ;;  %v1321_v3 = vadd.f32 %v2676_v1, %v1317_v43 }
 0xe01   :  { %v1327_v4 = vsel %vm455_vm3, %v1321_v3, -inf }
 0xe02   :  { %1328 = vmax.xlane.f32.xlu0 %v1327_v4  ;;  %v2305_v4 = vld [vmem:[%s2978_s6 + $0x10] sm:$0xff]  }
 0xe0f   :  { %1372 = vrot.lane.b32.xlu1 %v1116_v37, %s2478_s27 }
 0xe71   :  { %v1261_v5 = vpop.f32.mrb[28].mxu0  ;;  %v1310_v6 = vpop.f32.mrb[32].mxu1 }
 0xe72   :  { %v1318_v7 = vmul.f32 0.25, %v1261_v5  ;;  %v1319_v8 = vmul.f32 0.25, %v1310_v6  ;;  %v2200_v58 = vpop.f32.mrb[29].mxu0  ;;  %v2206_v9 = vpop.f32.mrb[33].mxu1 }
 0xe73   :  { %v1264_v10 = vpop.f32.mrb[30].mxu0  ;;  %v1313_v12 = vpop.f32.mrb[34].mxu1 }
 0xe74   :  { %v2201_v13 = vpop.f32.mrb[31].mxu0  ;;  %v2207_v14 = vpop.f32.mrb[35].mxu1  ;;  %v1322_v16 = vadd.f32 %v2682_v11, %v1318_v7  ;;  %v1323_v1 = vadd.f32 %v2684_v19, %v1319_v8  ;;  %v2306_v7 = vld [vmem:[%s2978_s6 + $0x18] sm:$0xff]  }
 0xe76   :  { %v1330_v17 = vsel %vm455_vm3, %v1322_v16, -inf  ;;  %v1333_v18 = vsel %vm455_vm3, %v1323_v1, -inf }
 0xe77   :  { %1331 = vmax.xlane.f32.xlu0 %v1330_v17 }
 0xe7b   :  { %1334 = vmax.xlane.f32.xlu0 %v1333_v18 }
 0xe8b   :  { %v1326_v20 = vpop.xlane.xlu1 %1325 }
 0xe8c   :  { %v1336_v21 = vsub.f32 %v1320_v31, %v1326_v20 }
 0xe8e   :  { %v1340_v22 = vmul.f32 1.442695, %v1336_v21 }
 0xe8f   :  { %v1373_v23 = vpop.permute.xlu1 %1372  ;;  %v1329_v24 = vpop.xlane.xlu0 %1328 }
 0xe90   :  { %2345 = vpow2.f32 %v1340_v22  ;;  %v1378_v25 = vsel %vm509_vm4, %v1373_v23, 0  ;;  %v1337_v26 = vsub.f32 %v1321_v3, %v1329_v24 }
 0xe91   :  { %2209 = vmatpush3.bf16.msra.mxu0 %v1378_v25 }
 0xe92   :  { %v1342_v29 = vmul.f32 1.442695, %v1337_v26  ;;  %2220 = vmatprep.subr.bf16.mxu0 %v2474_v15 }
 0xe94   :  { %2347 = vpow2.f32 %v1342_v29 }
 0xe9a   :  { %v2346_v11 = vpop.eup %2345 }
 0xe9b   :  { %v1348_v19 = vsel %vm455_vm3, %v2346_v11, 0.0 }
 0xe9c   :  { %1349 = vadd.xlane.f32.xlu1 %v1348_v19 }
 0xe9e   :  { %v2348_v30 = vpop.eup %2347 }
 0xe9f   :  { %v1351_v33 = vsel %vm455_vm3, %v2348_v30, 0.0 }
 0xea0   :  { %1352 = vadd.xlane.f32.xlu0 %v1351_v33 }
 0xf04   :  { %v1332_v34 = vpop.xlane.xlu0 %1331 }
 0xf05   :  { %v1338_v35 = vsub.f32 %v1322_v16, %v1332_v34 }
 0xf07   :  { %v1344_v36 = vmul.f32 1.442695, %v1338_v35 }
 0xf08   :  { %v1335_v37 = vpop.xlane.xlu0 %1334 }
 0xf09   :  { %2349 = vpow2.f32 %v1344_v36  ;;  %v1339_v38 = vsub.f32 %v1323_v1, %v1335_v37 }
 0xf0b   :  { %v1346_v39 = vmul.f32 1.442695, %v1339_v38 }
 0xf0d   :  { %2351 = vpow2.f32 %v1346_v39 }
 0xf13   :  { %v2350_v40 = vpop.eup %2349 }
 0xf14   :  { %v1354_v42 = vsel %vm455_vm3, %v2350_v40, 0.0 }
 0xf15   :  { %1355 = vadd.xlane.f32.xlu1 %v1354_v42 }
 0xf17   :  { %v2352_v44 = vpop.eup %2351 }
 0xf18   :  { %v1357_v45 = vsel %vm455_vm3, %v2352_v44, 0.0 }
 0xf19   :  { %1358 = vadd.xlane.f32.xlu0 %v1357_v45 }
 0xf26   :  { %1468 = vrot.lane.b32.xlu1 %v2825_v52, %s2478_s27 }
 0xf29   :  { %v1350_v46 = vpop.xlane.xlu1 %1349 }
 0xf2a   :  { %2353 = vrcp.f32 %v1350_v46  ;;  %1516 = vrot.lane.b32.xlu1 %v2823_v49, %s2478_s27 }
 0xf2d   :  { %v1353_v54 = vpop.xlane.xlu0 %1352 }
 0xf2e   :  { %2355 = vrcp.f32 %v1353_v54 }
 0xf2f   :  { %1420 = vrot.lane.b32.xlu0 %v2816_v41, %s2478_s27  ;;  %s2439_s27 = scalar_lea.vmem %s1929_s26, 32 }
 0xf30   :  { %p2440_p10 = scmp.ne.s32.totalorder %s1929_s26, %s2439_s27  ;;  %p2445_p12 = scmp.lt.s32.totalorder %s2439_s27, %s2439_s27 }
 0xf32   :  { %p2446_p13 = por %p2445_p12, %p2444_p11 }
 0xf34   :  { %v2354_v47 = vpop.eup %2353  ;;  %p2447_p0 = pnand %p2446_p13, %p2440_p10 }
 0xf35   :  { %v1364_v48 = vmul.f32 %v2354_v47, %v2346_v11  ;;  %v1996_v11 = vld [vmem:[%s2979_s7 + $0x1] ss:$0 sm:$0xff] }
 0xf37   :  { %v1368_v53 = vpack.c.bf16 %v1364_v48, %v1364_v48 }
 0xf38   :  { %v2356_v52 = vpop.eup %2355 }
 0xf39   :  { %2211 = vmatmul.mubr.msk.bf16.vlgmr.msra.gmra.mrb[32].mxu0 %vm455_vm3, %v1368_v53  ;;  %v1365_v41 = vmul.f32 %v2356_v52, %v2348_v30  ;;  %v2308_v52 = vld [vmem:[%s2982_s10 + $0x18] sm:$0xff]  }
 0xf3a   :  { %2222 = vmatprep.mubr.msk.bf16.mxu0 %vm2475_vm1, %v2474_v15 }
 0xf3b   :  { %v1369_v50 = vpack.c.bf16 %v1365_v41, %v1365_v41 }
 0xfa2   :  { %v1356_v55 = vpop.xlane.xlu1 %1355 }
 0xfa3   :  { %2357 = vrcp.f32 %v1356_v55 }
 0xfa6   :  { %v1469_v56 = vpop.permute.xlu1 %1468  ;;  %v1359_v57 = vpop.xlane.xlu0 %1358 }
 0xfa7   :  { %v1474_v49 = vsel %vm509_vm4, %v1469_v56, 0  ;;  %2359 = vrcp.f32 %v1359_v57 }
 0xfa8   :  { %2221 = vmatpush3.bf16.msra.mxu0 %v1474_v49 }
 0xfa9   :  { %2232 = vmatprep.subr.bf16.mxu0 %v2474_v15 }
 0xfaa   :  { %v1421_v59 = vpop.permute.xlu0 %1420  ;;  %v1517_v60 = vpop.permute.xlu1 %1516 }
 0xfab   :  { %v1426_v51 = vsel %vm509_vm4, %v1421_v59, 0  ;;  %v1522_v32 = vsel %vm509_vm4, %v1517_v60, 0 }
 0xfac   :  { %2215 = vmatpush3.bf16.msra.mxu1 %v1426_v51 }
 0xfad   :  { %v2358_v61 = vpop.eup %2357  ;;  %2226 = vmatprep.subr.bf16.mxu1 %v2474_v15 }
 0xfae   :  { %v1366_v31 = vmul.f32 %v2358_v61, %v2350_v40 }
 0xfaf   :  { %2217 = vmatmul.mubr.msk.bf16.vlgmr.msra.gmra.mrb[36].mxu1 %vm455_vm3, %v1369_v50  ;;  %v2002_v50 = vld [vmem:[%s2980_s8 + $0x1] ss:$0 sm:$0xff] }
 0xfb0   :  { %2227 = vmatpush3.bf16.msra.mxu1 %v1522_v32  ;;  %v1370_v43 = vpack.c.bf16 %v1366_v31, %v1366_v31  ;;  %2228 = vmatprep.mubr.msk.bf16.mxu1 %vm2475_vm1, %v2474_v15 }
 0xfb1   :  { %v2360_v62 = vpop.eup %2359  ;;  %2240 = vmatprep.subr.bf16.mxu1 %v2474_v15 }
 0xfb2   :  { %v1367_v63 = vmul.f32 %v2360_v62, %v2352_v44  ;;  %2223 = vmatmul.mubr.msk.bf16.vlgmr.msra.gmra.mrb[36].mxu0 %vm455_vm3, %v1370_v43  ;;  %v2003_v62 = vld [vmem:[%s2981_s9 + $0x1] ss:$0 sm:$0xff] }
 0xfb3   :  { %2236 = vmatprep.mubr.msk.bf16.mxu0 %vm2475_vm1, %v2474_v15  ;;  %2233 = vmatpush3.bf16.msra.mxu0 %v2305_v4  ;;  %v2309_v4 = vld [vmem:[%s2984_s12 + $0x20] sm:$0xff]  }
 0xfb4   :  { %v1371_v0 = vpack.c.bf16 %v1367_v63, %v1367_v63  ;;  %2234 = vmatprep.subr.bf16.mxu0 %v2474_v15 }
 0xfb7   :  { %2229 = vmatmul.mubr.msk.bf16.vlgmr.msra.gmra.mrb[40].mxu1 %vm455_vm3, %v1371_v0  ;;  %2235 = vmatpush3.bf16.msra.mxu0 %v2306_v7  ;;  %v2312_v7 = vld [vmem:[%s2984_s12 + $0x38] sm:$0xff]  }
 0xfb8   :  { %2244 = vmatprep.mubr.msk.bf16.mxu1 %vm2475_vm1, %v2474_v15  ;;  %2248 = vmatprep.subr.bf16.mxu0 %v2474_v15 }
0x100c   :  { %v1414_v2 = vpop.f32.mrb[32].mxu0 }
0x100d   :  { %v2212_v3 = vpop.f32.mrb[33].mxu0 }
0x100e   :  { %v1417_v5 = vpop.f32.mrb[34].mxu0 }
0x100f   :  { %v2213_v6 = vpop.f32.mrb[35].mxu0  ;;  %v2310_v5 = vld [vmem:[%s2984_s12 + $0x28] sm:$0xff]  }
0x1010   :  { %v2311_v6 = vld [vmem:[%s2984_s12 + $0x30] sm:$0xff]  }
0x1082   :  { %v1462_v8 = vpop.f32.mrb[36].mxu1 }
0x1083   :  { %v2218_v58 = vpop.f32.mrb[37].mxu1 }
0x1084   :  { %v1465_v9 = vpop.f32.mrb[38].mxu1 }
0x1085   :  { %v2219_v10 = vpop.f32.mrb[39].mxu1  ;;  %v1510_v12 = vpop.f32.mrb[36].mxu0 }
0x1086   :  { %v2224_v13 = vpop.f32.mrb[37].mxu0 }
0x1087   :  { %v1513_v14 = vpop.f32.mrb[38].mxu0 }
0x1088   :  { %v2225_v16 = vpop.f32.mrb[39].mxu0 }
0x108a   :  { %v1558_v17 = vpop.f32.mrb[40].mxu1 }
0x108b   :  { %v2288_v1 = vpack.i.bf16 %v1558_v17, %v1510_v12  ;;  %v2230_v18 = vpop.f32.mrb[41].mxu1 }
0x108c   :  { %v1561_v20 = vpop.f32.mrb[42].mxu1 }
0x108d   :  { %2289 = vrot.lane.b32.xlu1 %v2288_v1, %s2468_s0  ;;  %v2231_v21 = vpop.f32.mrb[43].mxu1 }
0x10ff   :  { %v2290_v22 = vpop.permute.xlu1 %2289 }
0x1100   :  { %v2292_v23 = vunpack.i.h.bf16 %v2290_v22  ;;  %v2291_v24 = vunpack.i.l.bf16 %v2290_v22 }
0x1102   :  { %v1573_v25 = vsel %vm229_vm2, %v1462_v8, %v2292_v23  ;;  %v1572_v26 = vsel %vm229_vm2, %v1414_v2, %v2291_v24  ;;  %v2009_v8 = vld [vmem:[%s2983_s11 + $0x1] ss:$0 sm:$0xff] }
0x1103   :  { %v1574_v29 = vpack.c.bf16 %v1573_v25, %v1572_v26 }
0x1105   :  { %2237 = vmatmul.mubr.msk.bf16.vlgmr.msra.gmra.mrb[40].mxu0 %vm98_vm0, %v1574_v29 }
0x1106   :  { %2256 = vmatprep.mubr.msk.bf16.mxu0 %vm2475_vm1, %v2474_v15  ;;  %2249 = vmatpush3.bf16.msra.mxu0 %v2309_v4  ;;  %v2031_v4 = vld [vmem:[%s2987_s15 + $0x1] ss:$0 sm:$0xff] }
0x1107   :  { %2250 = vmatprep.subr.bf16.mxu0 %v2474_v15 }
0x110a   :  { %2251 = vmatpush3.bf16.msra.mxu0 %v2310_v5 }
0x110b   :  { %2252 = vmatprep.subr.bf16.mxu0 %v2474_v15 }
0x110e   :  { %2253 = vmatpush3.bf16.msra.mxu0 %v2311_v6 }
0x110f   :  { %2254 = vmatprep.subr.bf16.mxu0 %v2474_v15 }
0x1112   :  { %2255 = vmatpush3.bf16.msra.mxu0 %v2312_v7 }
0x11d8   :  { %v1637_v19 = vpop.f32.mrb[40].mxu0 }
0x11d9   :  { %v1638_v30 = vadd.f32 %v1996_v11, %v1637_v19  ;;  %v2238_v33 = vpop.f32.mrb[41].mxu0 }
0x11da   :  { %v1640_v34 = vpop.f32.mrb[42].mxu0 }
0x11db   :  { %v1641_v35 = vadd.f32 %v1996_v11, %v1640_v34  ;;  %v2239_v36 = vpop.f32.mrb[43].mxu0  ;;  %v1644_v37 = vadd.f32 %v1638_v30, %v2803_v27 }
0x11dc   :  { %v2022_v36 = vld [vmem:[%s2985_s13 + $0x1] ss:$0 sm:$0xff] }
0x11dd   :  { %v1650_v38 = vsel %vm98_vm0, %v1644_v37, 0.0  ;;  %v1645_v39 = vadd.f32 %v1641_v35, %v2805_v28  ;;  %v2307_v28 = vld [vmem:[%s2982_s10 + $0x10] sm:$0xff]  }
0x11de   :  { %1651 = vadd.xlane.f32.xlu0 %v1650_v38  ;;  %2241 = vmatpush3.bf16.msra.mxu1 %v2307_v28 }
0x11df   :  { %v1653_v40 = vsel %vm98_vm0, %v1645_v39, 0.0  ;;  %2242 = vmatprep.subr.bf16.mxu1 %v2474_v15 }
0x11e0   :  { %1654 = vadd.xlane.f32.xlu1 %v1653_v40 }
0x11e2   :  { %2243 = vmatpush3.bf16.msra.mxu1 %v2308_v52 }
0x126b   :  { %v1652_v42 = vpop.xlane.xlu0 %1651 }
0x126c   :  { %v1656_v44 = vmul.f32 0.03125, %v1652_v42 }
0x126d   :  { %v1655_v45 = vpop.xlane.xlu1 %1654 }
0x126e   :  { %v1658_v46 = vsub.f32 %v1644_v37, %v1656_v44  ;;  %v1657_v47 = vmul.f32 0.03125, %v1655_v45 }
0x1270   :  { %v1659_v48 = vsub.f32 %v1645_v39, %v1657_v47  ;;  %v1660_v53 = vmul.f32 %v1658_v46, %v1658_v46 }
0x1272   :  { %v1662_v54 = vsel %vm98_vm0, %v1660_v53, 0.0  ;;  %v1661_v55 = vmul.f32 %v1659_v48, %v1659_v48 }
0x1273   :  { %1663 = vadd.xlane.f32.xlu0 %v1662_v54 }
0x1274   :  { %v1665_v27 = vsel %vm98_vm0, %v1661_v55, 0.0 }
0x1277   :  { %1666 = vadd.xlane.f32.xlu0 %v1665_v27 }
0x1300   :  { %v1664_v56 = vpop.xlane.xlu0 %1663 }
0x1301   :  { %v1668_v57 = vmul.f32 0.03125, %v1664_v56 }
0x1303   :  { %v1670_v49 = vadd.f32 1e-12, %v1668_v57 }
0x1304   :  { %v1667_v41 = vpop.xlane.xlu0 %1666 }
0x1305   :  { %2361 = vrsqrt.f32 %v1670_v49  ;;  %v1669_v59 = vmul.f32 0.03125, %v1667_v41 }
0x1307   :  { %v1671_v51 = vadd.f32 1e-12, %v1669_v59 }
0x1309   :  { %2363 = vrsqrt.f32 %v1671_v51 }
0x130f   :  { %v2362_v60 = vpop.eup %2361 }
0x1310   :  { %v1674_v61 = vmul.f32 %v2362_v60, %v1658_v46 }
0x1312   :  { %v1682_v32 = vmul.f32 %v2002_v50, %v1674_v61 }
0x1313   :  { %v2364_v31 = vpop.eup %2363 }
0x1314   :  { %v1675_v43 = vmul.f32 %v2364_v31, %v1659_v48  ;;  %v1690_v0 = vadd.f32 %v2003_v62, %v1682_v32 }
0x1316   :  { %v1683_v63 = vmul.f32 %v2002_v50, %v1675_v43 }
0x1318   :  { %v1691_v2 = vadd.f32 %v2003_v62, %v1683_v63  ;;  %v2030_v63 = vld [vmem:[%s2986_s14 + $0x1] ss:$0 sm:$0xff] }
0x131a   :  { %v1692_v3 = vpack.c.bf16 %v1691_v2, %v1690_v0 }
0x131c   :  { %2245 = vmatmul.mubr.msk.bf16.vlgmr.msra.gmra.mrb[44].mxu1 %vm98_vm0, %v1692_v3 }
0x13ef   :  { %v1755_v58 = vpop.f32.mrb[44].mxu1 }
0x13f0   :  { %v1756_v9 = vadd.f32 %v2009_v8, %v1755_v58  ;;  %v2246_v10 = vpop.f32.mrb[45].mxu1 }
0x13f1   :  { %v1758_v12 = vpop.f32.mrb[46].mxu1 }
0x13f2   :  { %v1764_v13 = vmul.f32 0.044715, %v1756_v9  ;;  %v1759_v14 = vadd.f32 %v2009_v8, %v1758_v12  ;;  %v2247_v16 = vpop.f32.mrb[47].mxu1  ;;  %v1762_v11 = vmul.f32 0.5, %v1756_v9 }
0x13f4   :  { %v1766_v17 = vmul.f32 %v1764_v13, %v1756_v9  ;;  %v1765_v1 = vmul.f32 0.044715, %v1759_v14  ;;  %v1763_v19 = vmul.f32 0.5, %v1759_v14 }
0x13f6   :  { %v1768_v18 = vmul.f32 %v1766_v17, %v1756_v9  ;;  %v1767_v20 = vmul.f32 %v1765_v1, %v1759_v14 }
0x13f8   :  { %v1770_v21 = vadd.f32 %v1768_v18, %v1756_v9  ;;  %v1769_v22 = vmul.f32 %v1767_v20, %v1759_v14 }
0x13fa   :  { %v1772_v23 = vmul.f32 0.7978846, %v1770_v21  ;;  %v1771_v15 = vadd.f32 %v1769_v22, %v1759_v14 }
0x13fc   :  { %2365 = vtanh.f32 %v1772_v23  ;;  %v1773_v24 = vmul.f32 0.7978846, %v1771_v15 }
0x13fe   :  { %2367 = vtanh.f32 %v1773_v24 }
0x1406   :  { %v2366_v25 = vpop.eup %2365 }
0x1407   :  { %v1776_v26 = vadd.f32 1.0, %v2366_v25 }
0x1408   :  { %v2368_v29 = vpop.eup %2367 }
0x1409   :  { %v1777_v30 = vadd.f32 1.0, %v2368_v29  ;;  %v1778_v33 = vmul.f32 %v1776_v26, %v1762_v11 }
0x140b   :  { %v1779_v34 = vmul.f32 %v1777_v30, %v1763_v19 }
0x140d   :  { %v1780_v35 = vpack.c.bf16 %v1779_v34, %v1778_v33 }
0x140f   :  { %2257 = vmatmul.mubr.msk.bf16.vlgmr.msra.gmra.mrb[44].mxu0 %vm947_vm5, %v1780_v35 }
0x14e2   :  { %v1859_v37 = vpop.f32.mrb[44].mxu0 }
0x14e3   :  { %v1860_v38 = vadd.f32 %v2022_v36, %v1859_v37  ;;  %v2258_v39 = vpop.f32.mrb[45].mxu0 }
0x14e4   :  { %v1862_v40 = vpop.f32.mrb[46].mxu0 }
0x14e5   :  { %v1863_v42 = vadd.f32 %v2022_v36, %v1862_v40  ;;  %v2259_v44 = vpop.f32.mrb[47].mxu0  ;;  %v1866_v45 = vadd.f32 %v1860_v38, %v1690_v0 }
0x14e7   :  { %v1872_v46 = vsel %vm98_vm0, %v1866_v45, 0.0  ;;  %v1867_v47 = vadd.f32 %v1863_v42, %v1691_v2 }
0x14e8   :  { %1873 = vadd.xlane.f32.xlu1 %v1872_v46 }
0x14e9   :  { %v1875_v48 = vsel %vm98_vm0, %v1867_v47, 0.0 }
0x14ea   :  { %1876 = vadd.xlane.f32.xlu0 %v1875_v48 }
0x1575   :  { %v1874_v53 = vpop.xlane.xlu1 %1873 }
0x1576   :  { %v1878_v54 = vmul.f32 0.03125, %v1874_v53 }
0x1577   :  { %v1877_v55 = vpop.xlane.xlu0 %1876 }
0x1578   :  { %v1880_v27 = vsub.f32 %v1866_v45, %v1878_v54  ;;  %v1879_v28 = vmul.f32 0.03125, %v1877_v55 }
0x157a   :  { %v1881_v52 = vsub.f32 %v1867_v47, %v1879_v28  ;;  %v1882_v56 = vmul.f32 %v1880_v27, %v1880_v27 }
0x157c   :  { %v1884_v57 = vsel %vm98_vm0, %v1882_v56, 0.0  ;;  %v1883_v49 = vmul.f32 %v1881_v52, %v1881_v52 }
0x157d   :  { %1885 = vadd.xlane.f32.xlu1 %v1884_v57 }
0x157e   :  { %v1887_v41 = vsel %vm98_vm0, %v1883_v49, 0.0 }
0x157f   :  { %1888 = vadd.xlane.f32.xlu0 %v1887_v41 }
0x160a   :  { %v1886_v59 = vpop.xlane.xlu1 %1885 }
0x160b   :  { %v1890_v51 = vmul.f32 0.03125, %v1886_v59 }
0x160c   :  { %v1889_v60 = vpop.xlane.xlu0 %1888 }
0x160d   :  { %v1892_v61 = vadd.f32 1e-12, %v1890_v51  ;;  %v1891_v50 = vmul.f32 0.03125, %v1889_v60 }
0x160f   :  { %2369 = vrsqrt.f32 %v1892_v61  ;;  %v1893_v31 = vadd.f32 1e-12, %v1891_v50 }
0x1611   :  { %2371 = vrsqrt.f32 %v1893_v31 }
0x1619   :  { %v2370_v32 = vpop.eup %2369 }
0x161a   :  { %v1896_v43 = vmul.f32 %v2370_v32, %v1880_v27 }
0x161b   :  { %v2372_v62 = vpop.eup %2371 }
0x161c   :  { %v1897_v0 = vmul.f32 %v2372_v62, %v1881_v52  ;;  %v1904_v2 = vmul.f32 %v2030_v63, %v1896_v43 }
0x161e   :  { %v1905_v3 = vmul.f32 %v2030_v63, %v1897_v0  ;;  %v1912_v6 = vadd.f32 %v2031_v4, %v1904_v2 }
0x1620   :  { %v1913_v5 = vadd.f32 %v2031_v4, %v1905_v3 }
0x1622   :  { %v1916_v7 = vrot.slane %v1913_v5, 7 }
0x1624   :  { %v1918_v8 = vsel %vm1917_vm6, %v1916_v7, %v1912_v6 }
0x1625   :  { %1921 = vst.msk [vmem:[#allocation8] sm:$0x3] %vm1920_vm7, %v1918_v8 }
0x1626   :  { %2450 = shalt.err (!%p2447_p0)
}
0x1627   :  { %s2994_s15 = sld [smem:[#allocation13_spill]] }
0x162d   :  { %s2451_s25 = scalar_lea.hbm %s2994_s15, 32 }
0x162e   :  { %p2452_p1 = scmp.ne.s32.totalorder %s2994_s15, %s2451_s25  ;;  %p2455_p2 = scmp.lt.u32.totalorder %s2451_s25, %s2994_s15 }
0x1630   :  { %p2457_p3 = pnand %p2455_p2, %p2452_p1 }
0x1632   :  { %2460 = shalt.err (!%p2457_p3)
}
0x1633   :  { %1931 = dma.vmem_to_hbm [thread:$0]  %s1929_s26, 32, %s2994_s15, [#allocation4]  }
0x1634   :  { %2465 = dma.done.wait [#allocation4], 32  }
0x1635   :  { %2466 = vsyncadd [#allocation4], 4294967264 }
0x1636   :  { %1935 = vsyncpa [#allocation3], 1 }
0x1637   :  { %1936 = vsyncpa [#allocation6], 1 }
0x1638   :  { %1937 = vsyncpa [#allocation4], 1 }

</bundles_post_ra>
